<compile_context>
chip_gen: v5e
topology: v5e:2x2
jax: 0.10.0
libtpu: 0.0.40
codegen_flags: <defaults>
</compile_context>

<pallas_src>
from functools import partial

import jax
import jax.numpy as jnp
import numpy as np
from jax.experimental import pallas as pl
from jax.experimental.pallas import tpu as pltpu


def _round_up(x, m):
    return (x + m - 1) // m * m


# ----------------------------------------------------------------------------
# Fused kernel (per batch block of BB images):
#   xpad  = zero-halo(x)                       (VMEM scratch, no value concat)
#   feat  = relu( sum_t shifted_x_t @ W_t + b )     # 3x3 conv, pad=1
#   vfS   = sum_H(feat)      (1/H folded into fc1_w)
#   gapS  = sum_W(vfS)       (1/(H*W) folded into blur_w)
#   idx   = gapS @ blur_pad                    # lane-dense (IDX_PAD) output
#   h     = relu(vfS @ fc1)
#   o     = h @ [pred_w | fc2_w | 0] + [pred_b | 0]   # lane-dense (OUTD_PAD)
# ----------------------------------------------------------------------------
def _fused_kernel(BB, H, W, Cin, Cout, OUTD_PAD, IDX_PAD,
                  x_ref, wc_ref, bc_ref, fc1_ref, wpz_ref, bpz_ref, blur_ref,
                  o_ref, idx_ref, xpad_ref):
    f32 = jnp.float32
    cdt = wc_ref.dtype                       # matmul operand dtype (f32 / bf16)

    # Zero-padded input tile built in a VMEM scratch (halo of 1).
    xpad_ref[...] = jnp.zeros_like(xpad_ref)
    xpad_ref[:, 1:H + 1, 1:W + 1, :] = x_ref[...]

    # 3x3 conv (pad=1) as 9 accumulated tap matmuls -> one f32 accumulator.
    acc = jnp.zeros((BB * H * W, Cout), f32)
    for t in range(9):
        dy, dx = t // 3, t % 3
        tap = xpad_ref[:, dy:dy + H, dx:dx + W, :].reshape(BB * H * W, Cin)
        acc = acc + jnp.dot(tap.astype(cdt), wc_ref[t * Cin:(t + 1) * Cin, :],
                            preferred_element_type=f32)
    feat = jnp.maximum(acc + bc_ref[...], 0.0)          # bias + ReLU (f32)

    # permute(0,3,1,2) -> AdaptiveAvgPool2d((None,1)) -> squeeze(3) == mean_H.
    # The 1/H and 1/(H*W) scales are folded into the head weights (wrapper),
    # so only sums are taken here.
    vf_sum = feat.reshape(BB, H, W, Cout).sum(axis=1)   # (BB, W, Cout)
    gap_sum = vf_sum.sum(axis=1)                        # (BB, Cout)

    # multi-task head uses the visual feature BEFORE fc1 (as in the module);
    # blur_w is zero-padded to IDX_PAD lanes -> unmasked lane-dense store.
    idx = jnp.dot(gap_sum.astype(cdt), blur_ref[...], preferred_element_type=f32)
    idx_ref[...] = idx.reshape(BB, 1, IDX_PAD)

    # contrastive + CTC heads: fc1 -> ReLU, then ONE fused matmul producing
    # [pred | z | 0-pad], already concatenated and lane-dense.
    h = jnp.maximum(
        jnp.dot(vf_sum.reshape(BB * W, Cout).astype(cdt), fc1_ref[...],
                preferred_element_type=f32), 0.0)
    pz = jnp.dot(h.astype(cdt), wpz_ref[...],
                 preferred_element_type=f32) + bpz_ref[...]
    o_ref[...] = pz.reshape(BB, W, OUTD_PAD)


def _vmem_estimate_bytes(BB, H, W, Cin, Cout, OUTD_PAD, IDX_PAD):
    f = 4
    x_blk = BB * H * W * Cin * f
    out_blk = (BB * W * OUTD_PAD + BB * IDX_PAD) * f
    weights = (9 * Cin * Cout + Cout + Cout * Cout
               + Cout * OUTD_PAD + OUTD_PAD + Cout * IDX_PAD) * f
    xpad = BB * (H + 2) * (W + 2) * Cin * f
    feat = 2 * BB * H * W * Cout * f        # accumulator + one live tap result
    return 2 * (x_blk + out_blk) + 2 * weights + xpad + feat


def _pick_batch_block(B, H, W, Cin, Cout, OUTD_PAD, IDX_PAD,
                      target_rows=1024, vmem_budget=40 << 20):
    """Largest divisor of B that (a) keeps >= 2 grid steps when possible
    (v7x dual-TC 'parallel' split), (b) fits a conservative VMEM budget, and
    (c) stops growing once each step has >= target_rows matmul rows
    (amortizes the ~0.35us per-grid-step overhead)."""
    best = 1
    for bb in range(1, B + 1):
        if B % bb:
            continue
        if B > 1 and B // bb < 2:
            continue
        if _vmem_estimate_bytes(bb, H, W, Cin, Cout, OUTD_PAD, IDX_PAD) > vmem_budget:
            break
        best = bb
        if bb * H * W >= target_rows:
            break
    return best


def model_forward(x_nchw, params, *, batch_block=None, use_bf16=False):
    """x_nchw: (B, Cin, H, W). Returns (prediction, z, idx) like Model.forward."""
    B, Cin, H, W = x_nchw.shape
    Cout = params["conv_w"].shape[0]
    Z = params["fc2_w"].shape[1]
    NC = params["pred_w"].shape[1]
    OUTD_PAD = _round_up(NC + Z, 128)       # lane-dense [pred | z | 0] slab
    IDX_PAD = _round_up(5, 128)             # lane-dense idx output

    if batch_block is None:
        batch_block = _pick_batch_block(B, H, W, Cin, Cout, OUTD_PAD, IDX_PAD)
    BB = batch_block
    assert B % BB == 0

    wdt = jnp.bfloat16 if use_bf16 else jnp.float32

    x = jnp.transpose(x_nchw, (0, 2, 3, 1)).astype(jnp.float32)   # NHWC
    # conv weights as an im2col matrix: rows ordered (ky, kx, cin)
    w_col = jnp.transpose(params["conv_w"], (2, 3, 1, 0)).reshape(9 * Cin, Cout)
    bc = params["conv_b"].reshape(1, Cout).astype(jnp.float32)
    # fold AdaptiveAvgPool's 1/H into fc1 and GAP's 1/(H*W) into blur_dec
    fc1_s = params["fc1_w"] / H
    blur_s = jnp.zeros((Cout, IDX_PAD), jnp.float32).at[:, :5].set(
        params["blur_w"] / (H * W))
    # fused [pred | z] head: one matmul, zero-padded to OUTD_PAD lanes
    w_pz = jnp.zeros((Cout, OUTD_PAD), jnp.float32)
    w_pz = w_pz.at[:, :NC].set(params["pred_w"]).at[:, NC:NC + Z].set(params["fc2_w"])
    b_pz = jnp.zeros((1, OUTD_PAD), jnp.float32).at[0, :NC].set(params["pred_b"])

    w_col = w_col.astype(wdt)
    fc1_s = fc1_s.astype(wdt)
    blur_s = blur_s.astype(wdt)
    w_pz = w_pz.astype(wdt)

    kernel = partial(_fused_kernel, BB, H, W, Cin, Cout, OUTD_PAD, IDX_PAD)
    vmem_est = _vmem_estimate_bytes(BB, H, W, Cin, Cout, OUTD_PAD, IDX_PAD)

    out, idx_out = pl.pallas_call(
        kernel,
        out_shape=(jax.ShapeDtypeStruct((B, W, OUTD_PAD), jnp.float32),
                   jax.ShapeDtypeStruct((B, 1, IDX_PAD), jnp.float32)),
        grid_spec=pltpu.PrefetchScalarGridSpec(
            num_scalar_prefetch=0,
            grid=(B // BB,),
            in_specs=[
                pl.BlockSpec((BB, H, W, Cin), lambda b: (b, 0, 0, 0)),
                pl.BlockSpec((9 * Cin, Cout), lambda b: (0, 0)),
                pl.BlockSpec((1, Cout), lambda b: (0, 0)),
                pl.BlockSpec((Cout, Cout), lambda b: (0, 0)),
                pl.BlockSpec((Cout, OUTD_PAD), lambda b: (0, 0)),
                pl.BlockSpec((1, OUTD_PAD), lambda b: (0, 0)),
                pl.BlockSpec((Cout, IDX_PAD), lambda b: (0, 0)),
            ],
            out_specs=[
                pl.BlockSpec((BB, W, OUTD_PAD), lambda b: (b, 0, 0)),
                pl.BlockSpec((BB, 1, IDX_PAD), lambda b: (b, 0, 0)),
            ],
            scratch_shapes=[pltpu.VMEM((BB, H + 2, W + 2, Cin), jnp.float32)]),
        compiler_params=pltpu.CompilerParams(
            dimension_semantics=("parallel",),
            vmem_limit_bytes=int(min(64 << 20, max(32 << 20, 2 * vmem_est)))),
    )(x, w_col, bc, fc1_s, w_pz, b_pz, blur_s)

    pred = out[:, :, :NC]
    z = out[:, :, NC:NC + Z]
    idx = idx_out[:, 0, :5]
    return pred, z, idx


# ----------------------------------------------------------------------------
# Pure-JAX reference for verification.
# ----------------------------------------------------------------------------
def model_reference(x_nchw, params):
    feat = jax.lax.conv_general_dilated(
        x_nchw, params["conv_w"], (1, 1), "SAME",
        dimension_numbers=("NCHW", "OIHW", "NCHW"))
    feat = jax.nn.relu(feat + params["conv_b"][None, :, None, None])
    vf = jnp.mean(jnp.transpose(feat, (0, 3, 1, 2)), axis=3)      # (B, W, Cout)
    idx = jnp.mean(vf, axis=1) @ params["blur_w"]
    h = jax.nn.relu(vf @ params["fc1_w"])
    z = h @ params["fc2_w"]
    pred = h @ params["pred_w"] + params["pred_b"]
    return pred, z, idx


if __name__ == "__main__":
    # Small synthetic config (opt): input_channel=4, output_channel=32,
    # z_channel=16, num_class=12, imgH=8, imgW=16, batch=2.
    B, Cin, H, W = 2, 4, 8, 16
    Cout, Z, NC = 32, 16, 12

    key = jax.random.PRNGKey(0)
    ks = jax.random.split(key, 8)
    params = {
        "conv_w": 0.1 * jax.random.normal(ks[0], (Cout, Cin, 3, 3), jnp.float32),
        "conv_b": 0.1 * jax.random.normal(ks[1], (Cout,), jnp.float32),
        "fc1_w":  0.1 * jax.random.normal(ks[2], (Cout, Cout), jnp.float32),
        "fc2_w":  0.1 * jax.random.normal(ks[3], (Cout, Z), jnp.float32),
        "pred_w": 0.1 * jax.random.normal(ks[4], (Cout, NC), jnp.float32),
        "pred_b": 0.1 * jax.random.normal(ks[5], (NC,), jnp.float32),
        "blur_w": 0.1 * jax.random.normal(ks[6], (Cout, 5), jnp.float32),
    }
    x = jax.random.normal(ks[7], (B, Cin, H, W), jnp.float32)

    pred_r, z_r, idx_r = model_reference(x, params)

    # f32 path (verification at tight tolerance).
    pred, z, idx = model_forward(x, params)
    jax.block_until_ready((pred, z, idx))
    assert pred.shape == (B, W, NC) and z.shape == (B, W, Z) and idx.shape == (B, 5)
    np.testing.assert_allclose(np.asarray(pred), np.asarray(pred_r), rtol=1e-4, atol=1e-4)
    np.testing.assert_allclose(np.asarray(z), np.asarray(z_r), rtol=1e-4, atol=1e-4)
    np.testing.assert_allclose(np.asarray(idx), np.asarray(idx_r), rtol=1e-4, atol=1e-4)

    # bf16-matmul path (v6e/v7x MXU fast path), loose tolerance.
    pred_b, z_b, idx_b = model_forward(x, params, use_bf16=True)
    jax.block_until_ready((pred_b, z_b, idx_b))
    np.testing.assert_allclose(np.asarray(pred_b), np.asarray(pred_r), rtol=3e-2, atol=3e-2)
    np.testing.assert_allclose(np.asarray(z_b), np.asarray(z_r), rtol=3e-2, atol=3e-2)
    np.testing.assert_allclose(np.asarray(idx_b), np.asarray(idx_r), rtol=3e-2, atol=3e-2)

    print("KERNEL_OK")
</pallas_src>

<mosaic_0001>
module attributes {stable_mosaic.version = 11 : i64} {
  func.func @_fused_kernel(%arg0: i32, %arg1: memref<1x8x16x4xf32, #tpu.memory_space<vmem>>, %arg2: memref<36x32xf32, #tpu.memory_space<vmem>>, %arg3: memref<1x32xf32, #tpu.memory_space<vmem>>, %arg4: memref<32x32xf32, #tpu.memory_space<vmem>>, %arg5: memref<32x128xf32, #tpu.memory_space<vmem>>, %arg6: memref<1x128xf32, #tpu.memory_space<vmem>>, %arg7: memref<32x128xf32, #tpu.memory_space<vmem>>, %arg8: memref<1x16x128xf32, #tpu.memory_space<vmem>>, %arg9: memref<1x1x128xf32, #tpu.memory_space<vmem>>, %arg10: memref<1x10x18x4xf32, #tpu.memory_space<vmem>>) attributes {dimension_semantics = [#tpu.dimension_semantics<parallel>], iteration_bounds = array<i64: 2>, scalar_prefetch = 0 : i64, scratch_operands = 1 : i64, tpu.core_type = #tpu.core_type<tc>, window_params = [{transform_indices = @transform_0, window_bounds = array<i64: 1, 8, 16, 4>}, {pipeline_mode = #tpu.pipeline_mode<synchronous>, transform_indices = @transform_1, window_bounds = array<i64: 36, 32>}, {pipeline_mode = #tpu.pipeline_mode<synchronous>, transform_indices = @transform_2, window_bounds = array<i64: 1, 32>}, {pipeline_mode = #tpu.pipeline_mode<synchronous>, transform_indices = @transform_3, window_bounds = array<i64: 32, 32>}, {pipeline_mode = #tpu.pipeline_mode<synchronous>, transform_indices = @transform_4, window_bounds = array<i64: 32, 128>}, {pipeline_mode = #tpu.pipeline_mode<synchronous>, transform_indices = @transform_5, window_bounds = array<i64: 1, 128>}, {pipeline_mode = #tpu.pipeline_mode<synchronous>, transform_indices = @transform_6, window_bounds = array<i64: 32, 128>}, {transform_indices = @transform_7, window_bounds = array<i64: 1, 16, 128>}, {transform_indices = @transform_8, window_bounds = array<i64: 1, 1, 128>}]} {
    %cst = arith.constant 0.000000e+00 : f32
    %0 = vector.broadcast %cst : f32 to vector<1x10x18x4xf32>
    %c0 = arith.constant 0 : index
    %c0_0 = arith.constant 0 : index
    %c0_1 = arith.constant 0 : index
    %c0_2 = arith.constant 0 : index
    %1 = vector.load %arg10[%c0, %c0_0, %c0_1, %c0_2] : memref<1x10x18x4xf32, #tpu.memory_space<vmem>>, vector<1x10x18x4xf32>
    tpu.vector_store %arg10[%c0, %c0_0, %c0_1, %c0_2], %0 {strides = array<i32>} : memref<1x10x18x4xf32, #tpu.memory_space<vmem>>, vector<1x10x18x4xf32>,
    %c0_3 = arith.constant 0 : index
    %c0_4 = arith.constant 0 : index
    %c0_5 = arith.constant 0 : index
    %c0_6 = arith.constant 0 : index
    %2 = vector.load %arg1[%c0_3, %c0_4, %c0_5, %c0_6] : memref<1x8x16x4xf32, #tpu.memory_space<vmem>>, vector<1x8x16x4xf32>
    %c0_7 = arith.constant 0 : index
    %c1 = arith.constant 1 : index
    %c1_8 = arith.constant 1 : index
    %c0_9 = arith.constant 0 : index
    %3 = vector.load %arg10[%c0_7, %c1, %c1_8, %c0_9] : memref<1x10x18x4xf32, #tpu.memory_space<vmem>>, vector<1x8x16x4xf32>
    tpu.vector_store %arg10[%c0_7, %c1, %c1_8, %c0_9], %2 {strides = array<i32>} : memref<1x10x18x4xf32, #tpu.memory_space<vmem>>, vector<1x8x16x4xf32>,
    %cst_10 = arith.constant 0.000000e+00 : f32
    %4 = vector.broadcast %cst_10 : f32 to vector<128x32xf32>
    %c0_11 = arith.constant 0 : index
    %c0_12 = arith.constant 0 : index
    %c0_13 = arith.constant 0 : index
    %c0_14 = arith.constant 0 : index
    %5 = vector.load %arg10[%c0_11, %c0_12, %c0_13, %c0_14] : memref<1x10x18x4xf32, #tpu.memory_space<vmem>>, vector<1x8x16x4xf32>
    %6 = vector.shape_cast %5 : vector<1x8x16x4xf32> to vector<128x4xf32>
    %c0_15 = arith.constant 0 : index
    %c0_16 = arith.constant 0 : index
    %7 = vector.load %arg2[%c0_15, %c0_16] : memref<36x32xf32, #tpu.memory_space<vmem>>, vector<4x32xf32>
    %cst_17 = arith.constant dense<0.000000e+00> : vector<128x32xf32>
    %8 = tpu.matmul %6, %7, %cst_17 {dimension_numbers = #tpu.dot_dimension_numbers<[1], [0], [0], [1], [0, 0, 1, 1], [], []>} : vector<128x4xf32>, vector<4x32xf32>, vector<128x32xf32> -> vector<128x32xf32>
    %9 = arith.addf %4, %8 : vector<128x32xf32>
    %c0_18 = arith.constant 0 : index
    %c0_19 = arith.constant 0 : index
    %c1_20 = arith.constant 1 : index
    %c0_21 = arith.constant 0 : index
    %10 = vector.load %arg10[%c0_18, %c0_19, %c1_20, %c0_21] : memref<1x10x18x4xf32, #tpu.memory_space<vmem>>, vector<1x8x16x4xf32>
    %11 = vector.shape_cast %10 : vector<1x8x16x4xf32> to vector<128x4xf32>
    %c4 = arith.constant 4 : index
    %c0_22 = arith.constant 0 : index
    %12 = vector.load %arg2[%c4, %c0_22] : memref<36x32xf32, #tpu.memory_space<vmem>>, vector<4x32xf32>
    %cst_23 = arith.constant dense<0.000000e+00> : vector<128x32xf32>
    %13 = tpu.matmul %11, %12, %cst_23 {dimension_numbers = #tpu.dot_dimension_numbers<[1], [0], [0], [1], [0, 0, 1, 1], [], []>} : vector<128x4xf32>, vector<4x32xf32>, vector<128x32xf32> -> vector<128x32xf32>
    %14 = arith.addf %9, %13 : vector<128x32xf32>
    %c0_24 = arith.constant 0 : index
    %c0_25 = arith.constant 0 : index
    %c2 = arith.constant 2 : index
    %c0_26 = arith.constant 0 : index
    %15 = vector.load %arg10[%c0_24, %c0_25, %c2, %c0_26] : memref<1x10x18x4xf32, #tpu.memory_space<vmem>>, vector<1x8x16x4xf32>
    %16 = vector.shape_cast %15 : vector<1x8x16x4xf32> to vector<128x4xf32>
    %c8 = arith.constant 8 : index
    %c0_27 = arith.constant 0 : index
    %17 = vector.load %arg2[%c8, %c0_27] : memref<36x32xf32, #tpu.memory_space<vmem>>, vector<4x32xf32>
    %cst_28 = arith.constant dense<0.000000e+00> : vector<128x32xf32>
    %18 = tpu.matmul %16, %17, %cst_28 {dimension_numbers = #tpu.dot_dimension_numbers<[1], [0], [0], [1], [0, 0, 1, 1], [], []>} : vector<128x4xf32>, vector<4x32xf32>, vector<128x32xf32> -> vector<128x32xf32>
    %19 = arith.addf %14, %18 : vector<128x32xf32>
    %c0_29 = arith.constant 0 : index
    %c1_30 = arith.constant 1 : index
    %c0_31 = arith.constant 0 : index
    %c0_32 = arith.constant 0 : index
    %20 = vector.load %arg10[%c0_29, %c1_30, %c0_31, %c0_32] : memref<1x10x18x4xf32, #tpu.memory_space<vmem>>, vector<1x8x16x4xf32>
    %21 = vector.shape_cast %20 : vector<1x8x16x4xf32> to vector<128x4xf32>
    %c12 = arith.constant 12 : index
    %c0_33 = arith.constant 0 : index
    %22 = vector.load %arg2[%c12, %c0_33] : memref<36x32xf32, #tpu.memory_space<vmem>>, vector<4x32xf32>
    %cst_34 = arith.constant dense<0.000000e+00> : vector<128x32xf32>
    %23 = tpu.matmul %21, %22, %cst_34 {dimension_numbers = #tpu.dot_dimension_numbers<[1], [0], [0], [1], [0, 0, 1, 1], [], []>} : vector<128x4xf32>, vector<4x32xf32>, vector<128x32xf32> -> vector<128x32xf32>
    %24 = arith.addf %19, %23 : vector<128x32xf32>
    %c0_35 = arith.constant 0 : index
    %c1_36 = arith.constant 1 : index
    %c1_37 = arith.constant 1 : index
    %c0_38 = arith.constant 0 : index
    %25 = vector.load %arg10[%c0_35, %c1_36, %c1_37, %c0_38] : memref<1x10x18x4xf32, #tpu.memory_space<vmem>>, vector<1x8x16x4xf32>
    %26 = vector.shape_cast %25 : vector<1x8x16x4xf32> to vector<128x4xf32>
    %c16 = arith.constant 16 : index
    %c0_39 = arith.constant 0 : index
    %27 = vector.load %arg2[%c16, %c0_39] : memref<36x32xf32, #tpu.memory_space<vmem>>, vector<4x32xf32>
    %cst_40 = arith.constant dense<0.000000e+00> : vector<128x32xf32>
    %28 = tpu.matmul %26, %27, %cst_40 {dimension_numbers = #tpu.dot_dimension_numbers<[1], [0], [0], [1], [0, 0, 1, 1], [], []>} : vector<128x4xf32>, vector<4x32xf32>, vector<128x32xf32> -> vector<128x32xf32>
    %29 = arith.addf %24, %28 : vector<128x32xf32>
    %c0_41 = arith.constant 0 : index
    %c1_42 = arith.constant 1 : index
    %c2_43 = arith.constant 2 : index
    %c0_44 = arith.constant 0 : index
    %30 = vector.load %arg10[%c0_41, %c1_42, %c2_43, %c0_44] : memref<1x10x18x4xf32, #tpu.memory_space<vmem>>, vector<1x8x16x4xf32>
    %31 = vector.shape_cast %30 : vector<1x8x16x4xf32> to vector<128x4xf32>
    %c20 = arith.constant 20 : index
    %c0_45 = arith.constant 0 : index
    %32 = vector.load %arg2[%c20, %c0_45] : memref<36x32xf32, #tpu.memory_space<vmem>>, vector<4x32xf32>
    %cst_46 = arith.constant dense<0.000000e+00> : vector<128x32xf32>
    %33 = tpu.matmul %31, %32, %cst_46 {dimension_numbers = #tpu.dot_dimension_numbers<[1], [0], [0], [1], [0, 0, 1, 1], [], []>} : vector<128x4xf32>, vector<4x32xf32>, vector<128x32xf32> -> vector<128x32xf32>
    %34 = arith.addf %29, %33 : vector<128x32xf32>
    %c0_47 = arith.constant 0 : index
    %c2_48 = arith.constant 2 : index
    %c0_49 = arith.constant 0 : index
    %c0_50 = arith.constant 0 : index
    %35 = vector.load %arg10[%c0_47, %c2_48, %c0_49, %c0_50] : memref<1x10x18x4xf32, #tpu.memory_space<vmem>>, vector<1x8x16x4xf32>
    %36 = vector.shape_cast %35 : vector<1x8x16x4xf32> to vector<128x4xf32>
    %c24 = arith.constant 24 : index
    %c0_51 = arith.constant 0 : index
    %37 = vector.load %arg2[%c24, %c0_51] : memref<36x32xf32, #tpu.memory_space<vmem>>, vector<4x32xf32>
    %cst_52 = arith.constant dense<0.000000e+00> : vector<128x32xf32>
    %38 = tpu.matmul %36, %37, %cst_52 {dimension_numbers = #tpu.dot_dimension_numbers<[1], [0], [0], [1], [0, 0, 1, 1], [], []>} : vector<128x4xf32>, vector<4x32xf32>, vector<128x32xf32> -> vector<128x32xf32>
    %39 = arith.addf %34, %38 : vector<128x32xf32>
    %c0_53 = arith.constant 0 : index
    %c2_54 = arith.constant 2 : index
    %c1_55 = arith.constant 1 : index
    %c0_56 = arith.constant 0 : index
    %40 = vector.load %arg10[%c0_53, %c2_54, %c1_55, %c0_56] : memref<1x10x18x4xf32, #tpu.memory_space<vmem>>, vector<1x8x16x4xf32>
    %41 = vector.shape_cast %40 : vector<1x8x16x4xf32> to vector<128x4xf32>
    %c28 = arith.constant 28 : index
    %c0_57 = arith.constant 0 : index
    %42 = vector.load %arg2[%c28, %c0_57] : memref<36x32xf32, #tpu.memory_space<vmem>>, vector<4x32xf32>
    %cst_58 = arith.constant dense<0.000000e+00> : vector<128x32xf32>
    %43 = tpu.matmul %41, %42, %cst_58 {dimension_numbers = #tpu.dot_dimension_numbers<[1], [0], [0], [1], [0, 0, 1, 1], [], []>} : vector<128x4xf32>, vector<4x32xf32>, vector<128x32xf32> -> vector<128x32xf32>
    %44 = arith.addf %39, %43 : vector<128x32xf32>
    %c0_59 = arith.constant 0 : index
    %c2_60 = arith.constant 2 : index
    %c2_61 = arith.constant 2 : index
    %c0_62 = arith.constant 0 : index
    %45 = vector.load %arg10[%c0_59, %c2_60, %c2_61, %c0_62] : memref<1x10x18x4xf32, #tpu.memory_space<vmem>>, vector<1x8x16x4xf32>
    %46 = vector.shape_cast %45 : vector<1x8x16x4xf32> to vector<128x4xf32>
    %c32 = arith.constant 32 : index
    %c0_63 = arith.constant 0 : index
    %47 = vector.load %arg2[%c32, %c0_63] : memref<36x32xf32, #tpu.memory_space<vmem>>, vector<4x32xf32>
    %cst_64 = arith.constant dense<0.000000e+00> : vector<128x32xf32>
    %48 = tpu.matmul %46, %47, %cst_64 {dimension_numbers = #tpu.dot_dimension_numbers<[1], [0], [0], [1], [0, 0, 1, 1], [], []>} : vector<128x4xf32>, vector<4x32xf32>, vector<128x32xf32> -> vector<128x32xf32>
    %49 = arith.addf %44, %48 : vector<128x32xf32>
    %c0_65 = arith.constant 0 : index
    %c0_66 = arith.constant 0 : index
    %50 = vector.load %arg3[%c0_65, %c0_66] : memref<1x32xf32, #tpu.memory_space<vmem>>, vector<1x32xf32>
    %51 = vector.broadcast %50 : vector<1x32xf32> to vector<128x32xf32>
    %52 = arith.addf %49, %51 : vector<128x32xf32>
    %cst_67 = arith.constant 0.000000e+00 : f32
    %53 = vector.broadcast %cst_67 : f32 to vector<128x32xf32>
    %54 = arith.maximumf %52, %53 : vector<128x32xf32>
    %55 = vector.shape_cast %54 : vector<128x32xf32> to vector<1x8x16x32xf32>
    %cst_68 = arith.constant dense<0.000000e+00> : vector<1x16x32xf32>
    %56 = vector.multi_reduction <add>, %55, %cst_68 [1] : vector<1x8x16x32xf32> to vector<1x16x32xf32>
    %cst_69 = arith.constant dense<0.000000e+00> : vector<1x32xf32>
    %57 = vector.multi_reduction <add>, %56, %cst_69 [1] : vector<1x16x32xf32> to vector<1x32xf32>
    %c0_70 = arith.constant 0 : index
    %c0_71 = arith.constant 0 : index
    %58 = vector.load %arg7[%c0_70, %c0_71] : memref<32x128xf32, #tpu.memory_space<vmem>>, vector<32x128xf32>
    %cst_72 = arith.constant dense<0.000000e+00> : vector<1x128xf32>
    %59 = tpu.matmul %57, %58, %cst_72 {dimension_numbers = #tpu.dot_dimension_numbers<[1], [0], [0], [1], [0, 0, 1, 1], [], []>} : vector<1x32xf32>, vector<32x128xf32>, vector<1x128xf32> -> vector<1x128xf32>
    %60 = vector.shape_cast %59 : vector<1x128xf32> to vector<1x1x128xf32>
    %c0_73 = arith.constant 0 : index
    %c0_74 = arith.constant 0 : index
    %c0_75 = arith.constant 0 : index
    %61 = vector.load %arg9[%c0_73, %c0_74, %c0_75] : memref<1x1x128xf32, #tpu.memory_space<vmem>>, vector<1x1x128xf32>
    tpu.vector_store %arg9[%c0_73, %c0_74, %c0_75], %60 {strides = array<i32>} : memref<1x1x128xf32, #tpu.memory_space<vmem>>, vector<1x1x128xf32>,
    %62 = vector.shape_cast %56 : vector<1x16x32xf32> to vector<16x32xf32>
    %c0_76 = arith.constant 0 : index
    %c0_77 = arith.constant 0 : index
    %63 = vector.load %arg4[%c0_76, %c0_77] : memref<32x32xf32, #tpu.memory_space<vmem>>, vector<32x32xf32>
    %cst_78 = arith.constant dense<0.000000e+00> : vector<16x32xf32>
    %64 = tpu.matmul %62, %63, %cst_78 {dimension_numbers = #tpu.dot_dimension_numbers<[1], [0], [0], [1], [0, 0, 1, 1], [], []>} : vector<16x32xf32>, vector<32x32xf32>, vector<16x32xf32> -> vector<16x32xf32>
    %cst_79 = arith.constant 0.000000e+00 : f32
    %65 = vector.broadcast %cst_79 : f32 to vector<16x32xf32>
    %66 = arith.maximumf %64, %65 : vector<16x32xf32>
    %c0_80 = arith.constant 0 : index
    %c0_81 = arith.constant 0 : index
    %67 = vector.load %arg5[%c0_80, %c0_81] : memref<32x128xf32, #tpu.memory_space<vmem>>, vector<32x128xf32>
    %cst_82 = arith.constant dense<0.000000e+00> : vector<16x128xf32>
    %68 = tpu.matmul %66, %67, %cst_82 {dimension_numbers = #tpu.dot_dimension_numbers<[1], [0], [0], [1], [0, 0, 1, 1], [], []>} : vector<16x32xf32>, vector<32x128xf32>, vector<16x128xf32> -> vector<16x128xf32>
    %c0_83 = arith.constant 0 : index
    %c0_84 = arith.constant 0 : index
    %69 = vector.load %arg6[%c0_83, %c0_84] : memref<1x128xf32, #tpu.memory_space<vmem>>, vector<1x128xf32>
    %70 = vector.broadcast %69 : vector<1x128xf32> to vector<16x128xf32>
    %71 = arith.addf %68, %70 : vector<16x128xf32>
    %72 = vector.shape_cast %71 : vector<16x128xf32> to vector<1x16x128xf32>
    %c0_85 = arith.constant 0 : index
    %c0_86 = arith.constant 0 : index
    %c0_87 = arith.constant 0 : index
    %73 = vector.load %arg8[%c0_85, %c0_86, %c0_87] : memref<1x16x128xf32, #tpu.memory_space<vmem>>, vector<1x16x128xf32>
    tpu.vector_store %arg8[%c0_85, %c0_86, %c0_87], %72 {strides = array<i32>} : memref<1x16x128xf32, #tpu.memory_space<vmem>>, vector<1x16x128xf32>,
    return
  }
  func.func @transform_0(%arg0: i32) -> (i32, i32, i32, i32) {
    %c0_i32 = arith.constant 0 : i32
    %c0_i32_0 = arith.constant 0 : i32
    %c0_i32_1 = arith.constant 0 : i32
    %c0_i32_2 = arith.constant 0 : i32
    return %arg0, %c0_i32, %c0_i32_0, %c0_i32_1 : i32, i32, i32, i32
  }
  func.func @transform_1(%arg0: i32) -> (i32, i32) {
    %c0_i32 = arith.constant 0 : i32
    %c0_i32_0 = arith.constant 0 : i32
    %c0_i32_1 = arith.constant 0 : i32
    return %c0_i32, %c0_i32_0 : i32, i32
  }
  func.func @transform_2(%arg0: i32) -> (i32, i32) {
    %c0_i32 = arith.constant 0 : i32
    %c0_i32_0 = arith.constant 0 : i32
    %c0_i32_1 = arith.constant 0 : i32
    return %c0_i32, %c0_i32_0 : i32, i32
  }
  func.func @transform_3(%arg0: i32) -> (i32, i32) {
    %c0_i32 = arith.constant 0 : i32
    %c0_i32_0 = arith.constant 0 : i32
    %c0_i32_1 = arith.constant 0 : i32
    return %c0_i32, %c0_i32_0 : i32, i32
  }
  func.func @transform_4(%arg0: i32) -> (i32, i32) {
    %c0_i32 = arith.constant 0 : i32
    %c0_i32_0 = arith.constant 0 : i32
    %c0_i32_1 = arith.constant 0 : i32
    return %c0_i32, %c0_i32_0 : i32, i32
  }
  func.func @transform_5(%arg0: i32) -> (i32, i32) {
    %c0_i32 = arith.constant 0 : i32
    %c0_i32_0 = arith.constant 0 : i32
    %c0_i32_1 = arith.constant 0 : i32
    return %c0_i32, %c0_i32_0 : i32, i32
  }
  func.func @transform_6(%arg0: i32) -> (i32, i32) {
    %c0_i32 = arith.constant 0 : i32
    %c0_i32_0 = arith.constant 0 : i32
    %c0_i32_1 = arith.constant 0 : i32
    return %c0_i32, %c0_i32_0 : i32, i32
  }
  func.func @transform_7(%arg0: i32) -> (i32, i32, i32) {
    %c0_i32 = arith.constant 0 : i32
    %c0_i32_0 = arith.constant 0 : i32
    %c0_i32_1 = arith.constant 0 : i32
    return %arg0, %c0_i32, %c0_i32_0 : i32, i32, i32
  }
  func.func @transform_8(%arg0: i32) -> (i32, i32, i32) {
    %c0_i32 = arith.constant 0 : i32
    %c0_i32_0 = arith.constant 0 : i32
    %c0_i32_1 = arith.constant 0 : i32
    return %arg0, %c0_i32, %c0_i32_0 : i32, i32, i32
  }
}

</mosaic_0001>

<bundles_post_ra>
// kernel: tpu_custom_call.1
= control target key start
LH: loop header
LB: loop body
LE: loop exit
PB: predicated region body
PF: predicated region fallthrough
CT: control target
= control target key end

     0   :  { %s3083_s0 = inlined_call_operand.vmem [shape: f32[2,8,16,4], index: 0, kind: input, shape index: {}]   ;;  %s3084_s1 = inlined_call_operand.vmem [shape: f32[36,32], index: 1, kind: input, shape index: {}]   ;;  %s3085_s2 = inlined_call_operand.vmem [shape: f32[1,32], index: 2, kind: input, shape index: {}]   ;;  %s3086_s3 = inlined_call_operand.vmem [shape: f32[32,32], index: 3, kind: input, shape index: {}]   ;;  %s3087_s4 = inlined_call_operand.vmem [shape: f32[32,128], index: 4, kind: input, shape index: {}]   ;;  %s3088_s5 = inlined_call_operand.vmem [shape: f32[1,128], index: 5, kind: input, shape index: {}]   ;;  %s3089_s6 = inlined_call_operand.vmem [shape: f32[32,128], index: 6, kind: input, shape index: {}]   ;;  %s3090_s7 = inlined_call_operand.hbm [shape: f32[2,16,128], index: 7, kind: output, shape index: {0}]   ;;  %s3091_s8 = inlined_call_operand.hbm [shape: f32[2,1,128], index: 8, kind: output, shape index: {1}]  }
   0x1   :  { %3092 = sst [smem:[#allocation11_spill]] %s3083_s0 }
   0x2   :  { %14 = vsyncpa [#allocation4], 0 }
   0x3   :  { %16 = vsyncpa [#allocation4 + $0x1], 0 }
   0x4   :  { %17 = vsyncpa [#allocation6], 0 }
   0x5   :  { %19 = vsyncpa [#allocation6 + $0x1], 0  ;;  %s2358_s27 = smov 0   ;;  %s2360_s28 = smov 0  }
   0x6   :  { %s2362_s29 = smov 0   ;;  %s2364_s30 = smov 0  }
   0x7 LB: > { %s2379_s9 = sadd.s32 4294967295, %s2308_s30   ;;  %s1991_s10 = sadd.s32 4294967294, %s2308_s30   ;;  %s2308_s30 = sphi %s2364_s30, %s3103_s30   ;;  %s2304_s29 = sphi %s2362_s29, %s3102_s29   ;;  %s2300_s28 = sphi %s2360_s28, %s3101_s28   ;;  %s2296_s27 = sphi %s2358_s27, %s3100_s27  }
   0x8   : > { %s2383_s11 = sadd.s32 1, %s2308_s30   ;;  %s184_s12 = sadd.s32 1, %s2304_s29 }
   0x9   : > { %s181_s13 = ssub.s32 %s2308_s30, %s2383_s11  ;;  %p194_p0 = scmp.ne.s32.totalorder %s2304_s29, %s2300_s28 }
   0xa   : > { %p182_p1 = scmp.eq.s32.totalorder %s181_s13, 0  ;;  %p195_p2 = scmp.eq.s32.totalorder %s2379_s9, 1 }
   0xb   : > { %p200_p3 = scmp.ne.s32.totalorder %s2300_s28, %s2296_s27  ;;  %p201_p4 = scmp.eq.s32.totalorder %s1991_s10, 1 }
   0xc   : > { %s2394_s14 = scalar_select %p182_p1, %s2304_s29, %s184_s12  }
   0xd   : > { %p2396_p5 = por %p195_p2, %p194_p0  ;;  %p2400_p6 = por %p201_p4, %p200_p3 }
   0xe   : > { %p1994_p7 = scmp.ge.s32.totalorder %s2308_s30, 1  ;;  %p271_p8 = scmp.lt.s32.totalorder %s2308_s30, 3 }
  0x10   : > { %p272_p9 = pnand %p1994_p7, %p271_p8 }
  0x12   : > { %275 = sbr.rel (%p272_p9) target bundleno = 762 (0x2fa), region = 48 }
  0x17   : > { %v412_v0 = vld [vmem:[%s3084_s1 + $0x4] sm:$0xf]  ;;  %vm461_vm0 = vcmask 1043456   ;;  %p309_p10 = scmp.lt.s32.totalorder %s2379_s9, 1  ;;  %vm314_vm1 = vcmask 31744   ;;  %v2310_v1 = vmov 0.0   ;;  %s1899_s19 = scalar_lea.hbm %s3091_s8, %s2379_s9 }
  0x18   : > { %2163 = vmatpush.msk.msra.mxu1 %vm461_vm0, %v412_v0  ;;  %2164 = vmatpush.msk.msra.mxu2 %vm461_vm0, %v412_v0  ;;  %325 = vst.msk [vmem:[#allocation2 + $0x48] sm:$0xff] %vm314_vm1, %v2310_v1  ;;  %v662_v2 = vld [vmem:[%s3084_s1 + $0x8] sm:$0xf]  ;;  %v960_v3 = vld [vmem:[%s3084_s1 + $0x10] sm:$0xf]  ;;  %s3095_s0 = sld [smem:[#allocation11_spill]] }
  0x19   : > { %s310_s23 = scalar_select %p309_p10, %s2379_s9, 1  ;;  %326 = vst.msk [vmem:[#allocation2 + $0x50] sm:$0xff] %vm314_vm1, %v2310_v1  ;;  %1998 = vmatpush.msk.msra.mxu0 %vm461_vm0, %v412_v0  ;;  %v395_v4 = vld [vmem:[%s3084_s1] sm:$0xf]  ;;  %vm317_vm2 = vcmask 25600   ;;  %vm1726_vm3 = vcmask 261120  }
  0x1a   : > { %2032 = vmatpush.msk.msrb.mxu2 %vm461_vm0, %v662_v2  ;;  %315 = vst.msk [vmem:[#allocation2] sm:$0xff] %vm314_vm1, %v2310_v1  ;;  %2015 = vmatpush.msk.msrb.mxu1 %vm461_vm0, %v395_v4  ;;  %v1259_v25 = vld [vmem:[%s3084_s1 + $0x18] sm:$0xf]  ;;  %v811_v26 = vld [vmem:[%s3084_s1 + $0xc] sm:$0xf]  ;;  %s3028_s10 = sand.u32 1, %s2300_s28  }
  0x1b   : > { %2066 = vmatpush.msk.msrb.mxu0 %vm461_vm0, %v960_v3  ;;  %s2161_s26 = sshll.u32 %s310_s23, 7  ;;  %316 = vst.msk [vmem:[#allocation2 + $0x8] sm:$0xff] %vm314_vm1, %v2310_v1  ;;  %2049 = vmatpush.msk.msra.mxu3 %vm461_vm0, %v811_v26  ;;  %v1408_v27 = vld [vmem:[%s3084_s1 + $0x1c] sm:$0xf]  ;;  %v1109_v28 = vld [vmem:[%s3084_s1 + $0x14] sm:$0xf] }
  0x1c   : > { %319 = vst.msk [vmem:[#allocation2 + $0x18] sm:$0xff] %vm314_vm1, %v2310_v1  ;;  %v1557_v35 = vld [vmem:[%s3084_s1 + $0x20] sm:$0xf]  ;;  %s308_s12 = scalar_lea.vmem [#allocation5], %s3028_s10  ;;  %s1903_s20 = sshll.u32 %s1899_s19, 4  ;;  %s1904_s20 = int_to_ptr.hbm [resolvable:$true] %s1903_s20 }
  0x1d   : > { %320 = vst.msk [vmem:[#allocation2 + $0x20] sm:$0xff] %vm314_vm1, %v2310_v1  ;;  %2117 = vmatpush.msk.msrb.mxu3 %vm461_vm0, %v1408_v27  ;;  %s1874_s21 = scalar_lea.sflag [#allocation6], %s3028_s10  ;;  %s2228_s22 = sshra.s32 %s1904_s20, 4  ;;  %s2229_s22 = int_to_ptr.hbm [resolvable:$true] %s2228_s22 }
  0x1e   : > { %s2433_s13 = scalar_lea.vmem %s3095_s0, %s2161_s26  ;;  %322 = vst.msk [vmem:[#allocation2 + $0x30] sm:$0xff] %vm314_vm1, %v2310_v1  ;;  %s2230_s23 = scalar_lea.hbm %s2229_s22, 1 }
  0x1f   : > { %v350_v5 = vld [vmem:[%s2433_s13 + $0x20] sm:$0xff]  ;;  %323 = vst.msk [vmem:[#allocation2 + $0x38] sm:$0xff] %vm314_vm1, %v2310_v1  ;;  %v355_v8 = vld [vmem:[%s2433_s13 + $0x48] sm:$0xff]  ;;  %v356_v11 = vld [vmem:[%s2433_s13 + $0x50] sm:$0xff]  ;;  %p2231_p11 = scmp.ne.s32.totalorder %s2229_s22, %s2230_s23  ;;  %s2234_s26 = scalar_lea.hbm %s3091_s8, 2 }
  0x20   : > { %367 = vst.msk [vmem:[#allocation2 + $0x49] sm:$0xff] %vm314_vm1, %v350_v5  ;;  %v351_v10 = vld [vmem:[%s2433_s13 + $0x28] sm:$0xff]  ;;  %v352_v13 = vld [vmem:[%s2433_s13 + $0x30] sm:$0xff]  ;;  %v357_v14 = vld [vmem:[%s2433_s13 + $0x58] sm:$0xff]  ;;  %p2235_p0 = scmp.lt.s32.totalorder %s2229_s22, %s3091_s8  ;;  %p2236_p1 = scmp.lt.s32.totalorder %s2234_s26, %s2230_s23 }
  0x21   : > { %328 = vst.msk [vmem:[#allocation2 + $0x60] sm:$0xff] %vm314_vm1, %v2310_v1  ;;  %v346_v15 = vld [vmem:[%s2433_s13] sm:$0xff]  ;;  %v353_v16 = vld [vmem:[%s2433_s13 + $0x38] sm:$0xff]  ;;  %v347_v18 = vld [vmem:[%s2433_s13 + $0x8] sm:$0xff]  ;;  %p2232_p12 = pnand %p2231_p11, %p2396_p5 }
  0x22   : > { %329 = vst.msk [vmem:[#allocation2 + $0x68] sm:$0xff] %vm314_vm1, %v2310_v1  ;;  %v396_v6 = vld [vmem:[#allocation2 + $0x1] sm:$0xff]  ;;  %v348_v22 = vld [vmem:[%s2433_s13 + $0x10] sm:$0xff]  ;;  %v349_v24 = vld [vmem:[%s2433_s13 + $0x18] sm:$0xff]  ;;  %p2237_p2 = por %p2236_p1, %p2235_p0 }
  0x23   : > { %331 = vst.msk [vmem:[#allocation2 + $0x78] sm:$0xff] %vm314_vm1, %v2310_v1  ;;  %1999 = vmatmul.msk.f32.vlgmr.msra.gmra.mxu0 %vm314_vm1, %v396_v6  ;;  %v358_v17 = vld [vmem:[%s2433_s13 + $0x60] sm:$0xff]  ;;  %v359_v20 = vld [vmem:[%s2433_s13 + $0x68] sm:$0xff]  ;;  %v360_v2 = vld [vmem:[%s2433_s13 + $0x70] sm:$0xff]  ;;  %p2233_p13 = pneg %p2232_p12 }
  0x24   : > { %332 = vst.msk [vmem:[#allocation2 + $0x80] sm:$0xff] %vm314_vm1, %v2310_v1  ;;  %v354_v19 = vld [vmem:[%s2433_s13 + $0x40] sm:$0xff]  ;;  %2134 = vmatpush.msk.msra.mxu0 %vm461_vm0, %v1557_v35  ;;  %v380_v47 = vld [vmem:[#allocation2 + $0x8] sm:$0xff]  ;;  %v361_v6 = vld [vmem:[%s2433_s13 + $0x78] sm:$0xff]  ;;  %s1901_s13 = sshll.u32 %s308_s12, 4  ;;  %s1902_s13 = int_to_ptr.vmem [resolvable:$true] %s1901_s13 }
  0x25   : > { %334 = vst.msk [vmem:[#allocation2 + $0x90] sm:$0xff] %vm314_vm1, %v2310_v1  ;;  %v379_v44 = vld [vmem:[#allocation2] sm:$0xff]  ;;  %p2238_p3 = pnand %p2237_p2, %p2233_p13 }
  0x26   : > { %335 = vst.msk [vmem:[#allocation2 + $0x98] sm:$0xff] %vm314_vm1, %v2310_v1  ;;  %v646_v45 = vld [vmem:[#allocation2 + $0x2] sm:$0xff] }
  0x27   : > { %v2446_v7 = vld [vmem:[#allocation2 + $0x49] sm:$0xff]  ;;  %337 = vst.msk [vmem:[#allocation2 + $0xa8] sm:$0xff] %vm314_vm1, %v2310_v1 }
  0x28   : > { %2005 = vmatmul.msk.f32.vlgmr.msra.gmra.mxu1 %vm314_vm1, %v2446_v7  ;;  %338 = vst.msk [vmem:[#allocation2 + $0xb0] sm:$0xff] %vm314_vm1, %v2310_v1  ;;  %v2573_v46 = vld [vmem:[#allocation2 + $0x48] sm:$0xff] }
  0x29   : > { %340 = vst.msk [vmem:[#allocation2 + $0xc0] sm:$0xff] %vm314_vm1, %v2310_v1  ;;  %2083 = vmatpush.msk.msra.mxu1 %vm461_vm0, %v1109_v28 }
  0x2a   : > { %341 = vst.msk [vmem:[#allocation2 + $0xc8] sm:$0xff] %vm314_vm1, %v2310_v1 }
  0x2b   : > { %343 = vst.msk [vmem:[#allocation2 + $0xd8] sm:$0xff] %vm314_vm1, %v2310_v1 }
  0x2c   : > { %344 = vst.msk [vmem:[#allocation2 + $0xe0] sm:$0xff] %vm314_vm1, %v2310_v1 }
  0x2d   : > { %333 = vst.msk [vmem:[#allocation2 + $0x88] sm:$0x3] %vm317_vm2, %v2310_v1 }
  0x2e   : > { %372 = vst.msk [vmem:[#allocation2 + $0x81] sm:$0xff] %vm314_vm1, %v355_v8 }
  0x2f   : > { %318 = vst.msk [vmem:[#allocation2 + $0x10] sm:$0x3] %vm317_vm2, %v2310_v1 }
  0x30   : > { %321 = vst.msk [vmem:[#allocation2 + $0x28] sm:$0x3] %vm317_vm2, %v2310_v1 }
  0x31   : > { %324 = vst.msk [vmem:[#allocation2 + $0x40] sm:$0x3] %vm317_vm2, %v2310_v1 }
  0x32   : > { %327 = vst.msk [vmem:[#allocation2 + $0x58] sm:$0x3] %vm317_vm2, %v2310_v1 }
  0x33   : > { %330 = vst.msk [vmem:[#allocation2 + $0x70] sm:$0x3] %vm317_vm2, %v2310_v1 }
  0x34   : > { %336 = vst.msk [vmem:[#allocation2 + $0xa0] sm:$0x3] %vm317_vm2, %v2310_v1 }
  0x35   : > { %v2467_v9 = vld [vmem:[#allocation2 + $0x81] sm:$0xff]  ;;  %339 = vst.msk [vmem:[#allocation2 + $0xb8] sm:$0x3] %vm317_vm2, %v2310_v1 }
  0x36   : > { %2010 = vmatmul.msk.f32.vlgmr.msra.gmra.mxu2 %vm314_vm1, %v2467_v9  ;;  %342 = vst.msk [vmem:[#allocation2 + $0xd0] sm:$0x3] %vm317_vm2, %v2310_v1  ;;  %v397_v12 = vld [vmem:[#allocation2 + $0x9] sm:$0xff] }
  0x37   : > { %345 = vst.msk [vmem:[#allocation2 + $0xe8] sm:$0x3] %vm317_vm2, %v2310_v1  ;;  %2000 = vmatmul.msk.f32.gmra.mxu0 %vm314_vm1, %v397_v12  ;;  %2100 = vmatpush.msk.msra.mxu2 %vm461_vm0, %v1259_v25  ;;  %v647_v48 = vld [vmem:[#allocation2 + $0xa] sm:$0xff] }
  0x38   : > { %368 = vst.msk [vmem:[#allocation2 + $0x51] sm:$0xff] %vm314_vm1, %v351_v10  ;;  %v2697_v10 = vld [vmem:[#allocation2 + $0x82] sm:$0xff] }
  0x39   : > { %373 = vst.msk [vmem:[#allocation2 + $0x91] sm:$0xff] %vm314_vm1, %v356_v11 }
  0x3a   : > { %369 = vst.msk [vmem:[#allocation2 + $0x61] sm:$0xff] %vm314_vm1, %v352_v13 }
  0x3b   : > { %374 = vst.msk [vmem:[#allocation2 + $0x99] sm:$0xff] %vm314_vm1, %v357_v14 }
  0x3c   : > { %363 = vst.msk [vmem:[#allocation2 + $0x19] sm:$0xff] %vm314_vm1, %v346_v15 }
  0x3d   : > { %370 = vst.msk [vmem:[#allocation2 + $0x69] sm:$0xff] %vm314_vm1, %v353_v16 }
  0x3e   : > { %375 = vst.msk [vmem:[#allocation2 + $0xa9] sm:$0xff] %vm314_vm1, %v358_v17 }
  0x3f   : > { %v2492_v21 = vld [vmem:[#allocation2 + $0x51] sm:$0xff]  ;;  %364 = vst.msk [vmem:[#allocation2 + $0x21] sm:$0xff] %vm314_vm1, %v347_v18 }
  0x40   : > { %2006 = vmatmul.msk.f32.gmra.mxu1 %vm314_vm1, %v2492_v21  ;;  %v2498_v23 = vld [vmem:[#allocation2 + $0x91] sm:$0xff]  ;;  %371 = vst.msk [vmem:[#allocation2 + $0x79] sm:$0xff] %vm314_vm1, %v354_v19 }
  0x41   : > { %2011 = vmatmul.msk.f32.gmra.mxu2 %vm314_vm1, %v2498_v23  ;;  %376 = vst.msk [vmem:[#allocation2 + $0xb1] sm:$0xff] %vm314_vm1, %v359_v20  ;;  %v2525_v31 = vld [vmem:[#allocation2 + $0x61] sm:$0xff]  ;;  %v2580_v49 = vld [vmem:[#allocation2 + $0x50] sm:$0xff] }
  0x42   : > { %365 = vst.msk [vmem:[#allocation2 + $0x31] sm:$0xff] %vm314_vm1, %v348_v22  ;;  %v2527_v32 = vld [vmem:[#allocation2 + $0x99] sm:$0xff]  ;;  %v2631_v58 = vld [vmem:[#allocation2 + $0x4a] sm:$0xff] }
  0x43   : > { %v398_v29 = vld [vmem:[#allocation2 + $0x19] sm:$0xff]  ;;  %366 = vst.msk [vmem:[#allocation2 + $0x39] sm:$0xff] %vm314_vm1, %v349_v24  ;;  %v2637_v59 = vld [vmem:[#allocation2 + $0x90] sm:$0xff] }
  0x44   : > { %v795_v30 = vld [vmem:[#allocation2 + $0x18] sm:$0xff]  ;;  %2001 = vmatmul.msk.f32.gmra.mxu0 %vm314_vm1, %v398_v29  ;;  %v2539_v36 = vld [vmem:[#allocation2 + $0x69] sm:$0xff]  ;;  %v2590_v51 = vld [vmem:[#allocation2 + $0x60] sm:$0xff]  ;;  %377 = vst.msk [vmem:[#allocation2 + $0xc1] sm:$0xff] %vm314_vm1, %v360_v2 }
  0x45   : > { %2050 = vmatmul.msk.f32.vlgmr.msra.gmra.mxu3 %vm314_vm1, %v795_v30  ;;  %v2541_v37 = vld [vmem:[#allocation2 + $0xa9] sm:$0xff]  ;;  %v2643_v60 = vld [vmem:[#allocation2 + $0x52] sm:$0xff]  ;;  %378 = vst.msk [vmem:[#allocation2 + $0xc9] sm:$0xff] %vm314_vm1, %v361_v6  ;;  %v2727_v19 = vld [vmem:[#allocation2 + $0x9a] sm:$0xff] }
  0x46   : > { %v399_v33 = vld [vmem:[#allocation2 + $0x21] sm:$0xff]  ;;  %v2649_v61 = vld [vmem:[#allocation2 + $0x98] sm:$0xff]  ;;  %v2667_v0 = vld [vmem:[#allocation2 + $0x6a] sm:$0xff] }
  0x47   : > { %v796_v34 = vld [vmem:[#allocation2 + $0x20] sm:$0xff]  ;;  %v2601_v53 = vld [vmem:[#allocation2 + $0x68] sm:$0xff]  ;;  %v2613_v55 = vld [vmem:[#allocation2 + $0x78] sm:$0xff] }
  0x48   : > { %2007 = vmatmul.msk.f32.gmra.mxu1 %vm314_vm1, %v2525_v31  ;;  %v2555_v40 = vld [vmem:[#allocation2 + $0x79] sm:$0xff]  ;;  %v2557_v41 = vld [vmem:[#allocation2 + $0xb1] sm:$0xff]  ;;  %v2596_v52 = vld [vmem:[#allocation2 + $0x22] sm:$0xff] }
  0x49   : > { %2012 = vmatmul.msk.f32.gmra.mxu2 %vm314_vm1, %v2527_v32  ;;  %v2547_v38 = vld [vmem:[#allocation2 + $0x31] sm:$0xff]  ;;  %v2585_v50 = vld [vmem:[#allocation2 + $0x1a] sm:$0xff]  ;;  %v2655_v62 = vld [vmem:[#allocation2 + $0x62] sm:$0xff] }
  0x4a   : > { %v2549_v39 = vld [vmem:[#allocation2 + $0x30] sm:$0xff]  ;;  %v2563_v42 = vld [vmem:[#allocation2 + $0x39] sm:$0xff]  ;;  %v2661_v63 = vld [vmem:[#allocation2 + $0xa8] sm:$0xff] }
  0x4b   : > { %v2565_v43 = vld [vmem:[#allocation2 + $0x38] sm:$0xff]  ;;  %v2625_v57 = vld [vmem:[#allocation2 + $0x80] sm:$0xff]  ;;  %v2673_v1 = vld [vmem:[#allocation2 + $0xb0] sm:$0xff] }
  0x4c   : > { %2002 = vmatmul.msk.f32.gmra.mxu0 %vm314_vm1, %v399_v33  ;;  %v2607_v54 = vld [vmem:[#allocation2 + $0x32] sm:$0xff]  ;;  %v2619_v56 = vld [vmem:[#allocation2 + $0x3a] sm:$0xff]  ;;  %v2705_v13 = vld [vmem:[#allocation2 + $0xc8] sm:$0xff] }
  0x4d   : > { %2051 = vmatmul.msk.f32.gmra.mxu3 %vm314_vm1, %v796_v34  ;;  %v2681_v4 = vld [vmem:[#allocation2 + $0x7a] sm:$0xff]  ;;  %v2713_v15 = vld [vmem:[#allocation2 + $0x92] sm:$0xff]  ;;  %v2743_v26 = vld [vmem:[#allocation2 + $0xaa] sm:$0xff] }
  0x4e   : > { %v2687_v5 = vld [vmem:[#allocation2 + $0xc0] sm:$0xff] }
  0x50   : > { %2008 = vmatmul.msk.f32.gmra.mxu1 %vm314_vm1, %v2539_v36 }
  0x51   : > { %2013 = vmatmul.msk.f32.gmra.mxu2 %vm314_vm1, %v2541_v37 }
  0x54   : > { %2003 = vmatmul.msk.f32.gmra.mxu0 %vm314_vm1, %v2547_v38 }
  0x55   : > { %2052 = vmatmul.msk.f32.gmra.mxu3 %vm314_vm1, %v2549_v39 }
  0x58   : > { %2009 = vmatmul.msk.f32.gmra.mxu1 %vm314_vm1, %v2555_v40 }
  0x59   : > { %2014 = vmatmul.msk.f32.gmra.mxu2 %vm314_vm1, %v2557_v41 }
  0x5c   : > { %2004 = vmatmul.msk.f32.gmra.mxu0 %vm314_vm1, %v2563_v42 }
  0x5d   : > { %2053 = vmatmul.msk.f32.gmra.mxu3 %vm314_vm1, %v2565_v43 }
  0x60   : > { %2016 = vmatmul.msk.f32.vlgmr.msrb.gmra.mxu1 %vm314_vm1, %v379_v44 }
  0x61   : > { %2033 = vmatmul.msk.f32.vlgmr.msrb.gmra.mxu2 %vm314_vm1, %v646_v45 }
  0x64   : > { %2067 = vmatmul.msk.f32.vlgmr.msrb.gmra.mxu0 %vm314_vm1, %v398_v29  ;;  %v2751_v29 = vld [vmem:[#allocation2 + $0xc1] sm:$0xff] }
  0x65   : > { %2054 = vmatmul.msk.f32.gmra.mxu3 %vm314_vm1, %v2573_v46 }
  0x68   : > { %2017 = vmatmul.msk.f32.gmra.mxu1 %vm314_vm1, %v380_v47 }
  0x69   : > { %2034 = vmatmul.msk.f32.gmra.mxu2 %vm314_vm1, %v647_v48 }
  0x6c   : > { %2068 = vmatmul.msk.f32.gmra.mxu0 %vm314_vm1, %v399_v33 }
  0x6d   : > { %2055 = vmatmul.msk.f32.gmra.mxu3 %vm314_vm1, %v2580_v49 }
  0x70   : > { %2018 = vmatmul.msk.f32.gmra.mxu1 %vm314_vm1, %v795_v30 }
  0x71   : > { %2035 = vmatmul.msk.f32.gmra.mxu2 %vm314_vm1, %v2585_v50 }
  0x74   : > { %2069 = vmatmul.msk.f32.gmra.mxu0 %vm314_vm1, %v2547_v38 }
  0x75   : > { %2056 = vmatmul.msk.f32.gmra.mxu3 %vm314_vm1, %v2590_v51 }
  0x78   : > { %2019 = vmatmul.msk.f32.gmra.mxu1 %vm314_vm1, %v796_v34  ;;  %v2761_v34 = vld [vmem:[#allocation2 + $0xb2] sm:$0xff] }
  0x79   : > { %2036 = vmatmul.msk.f32.gmra.mxu2 %vm314_vm1, %v2596_v52 }
  0x7c   : > { %2070 = vmatmul.msk.f32.gmra.mxu0 %vm314_vm1, %v2563_v42 }
  0x7d   : > { %2057 = vmatmul.msk.f32.gmra.mxu3 %vm314_vm1, %v2601_v53 }
  0x80   : > { %2020 = vmatmul.msk.f32.gmra.mxu1 %vm314_vm1, %v2549_v39 }
  0x81   : > { %2037 = vmatmul.msk.f32.gmra.mxu2 %vm314_vm1, %v2607_v54 }
  0x84   : > { %2071 = vmatmul.msk.f32.gmra.mxu0 %vm314_vm1, %v2446_v7 }
  0x85   : > { %2058 = vmatmul.msk.f32.gmra.mxu3 %vm314_vm1, %v2613_v55 }
  0x88   : > { %2021 = vmatmul.msk.f32.gmra.mxu1 %vm314_vm1, %v2565_v43 }
  0x89   : > { %2038 = vmatmul.msk.f32.gmra.mxu2 %vm314_vm1, %v2619_v56 }
  0x8c   : > { %2072 = vmatmul.msk.f32.gmra.mxu0 %vm314_vm1, %v2492_v21 }
  0x8d   : > { %2059 = vmatmul.msk.f32.gmra.mxu3 %vm314_vm1, %v2625_v57 }
  0x90   : > { %2022 = vmatmul.msk.f32.gmra.mxu1 %vm314_vm1, %v2573_v46 }
  0x91   : > { %2039 = vmatmul.msk.f32.gmra.mxu2 %vm314_vm1, %v2631_v58 }
  0x94   : > { %2073 = vmatmul.msk.f32.gmra.mxu0 %vm314_vm1, %v2525_v31 }
  0x95   : > { %2060 = vmatmul.msk.f32.gmra.mxu3 %vm314_vm1, %v2637_v59 }
  0x98   : > { %2023 = vmatmul.msk.f32.gmra.mxu1 %vm314_vm1, %v2580_v49 }
  0x99   : > { %2040 = vmatmul.msk.f32.gmra.mxu2 %vm314_vm1, %v2643_v60 }
  0x9c   : > { %2074 = vmatmul.msk.f32.gmra.mxu0 %vm314_vm1, %v2539_v36 }
  0x9d   : > { %2061 = vmatmul.msk.f32.gmra.mxu3 %vm314_vm1, %v2649_v61 }
  0xa0   : > { %2024 = vmatmul.msk.f32.gmra.mxu1 %vm314_vm1, %v2590_v51  ;;  %v482_v3 = vpop.f32.mrf.mxu0 }
  0xa1   : > { %2041 = vmatmul.msk.f32.gmra.mxu2 %vm314_vm1, %v2655_v62 }
  0xa4   : > { %2075 = vmatmul.msk.f32.gmra.mxu0 %vm314_vm1, %v2555_v40 }
  0xa5   : > { %2062 = vmatmul.msk.f32.gmra.mxu3 %vm314_vm1, %v2661_v63  ;;  %v2690_v8 = vpop.f32.mrf.mxu1 }
  0xa8   : > { %2025 = vmatmul.msk.f32.gmra.mxu1 %vm314_vm1, %v2601_v53 }
  0xa9   : > { %2042 = vmatmul.msk.f32.gmra.mxu2 %vm314_vm1, %v2667_v0 }
  0xac   : > { %2076 = vmatmul.msk.f32.gmra.mxu0 %vm314_vm1, %v2467_v9 }
  0xad   : > { %2063 = vmatmul.msk.f32.gmra.mxu3 %vm314_vm1, %v2673_v1 }
  0xb0   : > { %2026 = vmatmul.msk.f32.gmra.mxu1 %vm314_vm1, %v2613_v55 }
  0xb1   : > { %2043 = vmatmul.msk.f32.gmra.mxu2 %vm314_vm1, %v2681_v4 }
  0xb4   : > { %2077 = vmatmul.msk.f32.gmra.mxu0 %vm314_vm1, %v2498_v23  ;;  %v485_v11 = vpop.f32.mrf.mxu0 }
  0xb5   : > { %2064 = vmatmul.msk.f32.gmra.mxu3 %vm314_vm1, %v2687_v5 }
  0xb8   : > { %2027 = vmatmul.msk.f32.gmra.mxu1 %vm314_vm1, %v2625_v57 }
  0xb9   : > { %2044 = vmatmul.msk.f32.gmra.mxu2 %vm314_vm1, %v2697_v10  ;;  %v2703_v12 = vpop.f32.mrf.mxu2 }
  0xbc   : > { %2078 = vmatmul.msk.f32.gmra.mxu0 %vm314_vm1, %v2527_v32 }
  0xbd   : > { %2065 = vmatmul.msk.f32.gmra.mxu3 %vm314_vm1, %v2705_v13  ;;  %v2711_v14 = vpop.f32.mrf.mxu1 }
  0xc0   : > { %2028 = vmatmul.msk.f32.gmra.mxu1 %vm314_vm1, %v2637_v59 }
  0xc1   : > { %2045 = vmatmul.msk.f32.gmra.mxu2 %vm314_vm1, %v2713_v15  ;;  %v488_v16 = vpop.f32.mrf.mxu0 }
  0xc4   : > { %v2719_v17 = vpop.f32.mrf.mxu2  ;;  %2079 = vmatmul.msk.f32.gmra.mxu0 %vm314_vm1, %v2541_v37 }
  0xc5   : > { %2118 = vmatmul.msk.f32.vlgmr.msrb.gmra.mxu3 %vm314_vm1, %v2547_v38  ;;  %v2725_v18 = vpop.f32.mrf.mxu1 }
  0xc8   : > { %v880_v20 = vpop.f32.mrf.mxu3  ;;  %2029 = vmatmul.msk.f32.gmra.mxu1 %vm314_vm1, %v2649_v61 }
  0xc9   : > { %2046 = vmatmul.msk.f32.gmra.mxu2 %vm314_vm1, %v2727_v19  ;;  %v2733_v22 = vpop.f32.mrf.mxu0 }
  0xcc   : > { %v2735_v24 = vpop.f32.mrf.mxu2  ;;  %2080 = vmatmul.msk.f32.gmra.mxu0 %vm314_vm1, %v2557_v41 }
  0xcd   : > { %2119 = vmatmul.msk.f32.gmra.mxu3 %vm314_vm1, %v2563_v42  ;;  %v2741_v25 = vpop.f32.mrf.mxu1  ;;  %v2769_v42 = vld [vmem:[#allocation2 + $0xc9] sm:$0xff] }
  0xd0   : > { %v883_v27 = vpop.f32.mrf.mxu3  ;;  %2030 = vmatmul.msk.f32.gmra.mxu1 %vm314_vm1, %v2661_v63 }
  0xd1   : > { %2047 = vmatmul.msk.f32.gmra.mxu2 %vm314_vm1, %v2743_v26  ;;  %v2749_v28 = vpop.f32.mrf.mxu0 }
  0xd4   : > { %v2753_v30 = vpop.f32.mrf.mxu2  ;;  %2081 = vmatmul.msk.f32.gmra.mxu0 %vm314_vm1, %v2751_v29 }
  0xd5   : > { %3096 = vst [vmem:[#allocation9_spill] sm:$0xff] %v2753_v30  ;;  %2120 = vmatmul.msk.f32.gmra.mxu3 %vm314_vm1, %v2446_v7  ;;  %v2759_v33 = vpop.f32.mrf.mxu1 }
  0xd8   : > { %v886_v35 = vpop.f32.mrf.mxu3  ;;  %2031 = vmatmul.msk.f32.gmra.mxu1 %vm314_vm1, %v2673_v1 }
  0xd9   : > { %2048 = vmatmul.msk.f32.gmra.mxu2 %vm314_vm1, %v2761_v34  ;;  %v2767_v38 = vpop.f32.mrf.mxu0 }
  0xdc   : > { %v2771_v44 = vpop.f32.mrf.mxu2  ;;  %2082 = vmatmul.msk.f32.gmra.mxu0 %vm314_vm1, %v2769_v42 }
  0xdd   : > { %3097 = vst [vmem:[#allocation10_spill] sm:$0xff] %v2771_v44  ;;  %2121 = vmatmul.msk.f32.gmra.mxu3 %vm314_vm1, %v2492_v21  ;;  %v598_v7 = vpop.f32.mrf.mxu1 }
  0xde   : > { %v599_v48 = vadd.f32 %v598_v7, %v482_v3 }
  0xe0   : > { %v889_v45 = vpop.f32.mrf.mxu3  ;;  %2084 = vmatmul.msk.f32.vlgmr.msra.gmra.mxu1 %vm314_vm1, %v2585_v50 }
  0xe1   : > { %2101 = vmatmul.msk.f32.vlgmr.msra.gmra.mxu2 %vm314_vm1, %v2549_v39  ;;  %v1029_v47 = vpop.f32.mrf.mxu0 }
  0xe4   : > { %v731_v2 = vpop.f32.mrf.mxu2  ;;  %2135 = vmatmul.msk.f32.vlgmr.msra.gmra.mxu0 %vm314_vm1, %v2607_v54 }
  0xe5   : > { %2122 = vmatmul.msk.f32.gmra.mxu3 %vm314_vm1, %v2525_v31  ;;  %v779_v6 = vadd.f32 %v731_v2, %v599_v48  ;;  %v601_v44 = vpop.f32.mrf.mxu1 }
  0xe6   : > { %v602_v3 = vadd.f32 %v601_v44, %v485_v11 }
  0xe7   : > { %v928_v21 = vadd.f32 %v880_v20, %v779_v6 }
  0xe8   : > { %v892_v30 = vpop.f32.mrf.mxu3  ;;  %2085 = vmatmul.msk.f32.gmra.mxu1 %vm314_vm1, %v2596_v52 }
  0xe9   : > { %v2787_v50 = vadd.f32 %v1029_v47, %v928_v21  ;;  %2102 = vmatmul.msk.f32.gmra.mxu2 %vm314_vm1, %v2565_v43  ;;  %v1032_v39 = vpop.f32.mrf.mxu0 }
  0xec   : > { %v734_v7 = vpop.f32.mrf.mxu2  ;;  %2136 = vmatmul.msk.f32.gmra.mxu0 %vm314_vm1, %v2619_v56 }
  0xed   : > { %2123 = vmatmul.msk.f32.gmra.mxu3 %vm314_vm1, %v2539_v36  ;;  %v780_v31 = vadd.f32 %v734_v7, %v602_v3  ;;  %v604_v20 = vpop.f32.mrf.mxu1 }
  0xee   : > { %v605_v11 = vadd.f32 %v604_v20, %v488_v16 }
  0xef   : > { %v929_v48 = vadd.f32 %v883_v27, %v780_v31 }
  0xf0   : > { %v895_v2 = vpop.f32.mrf.mxu3  ;;  %2086 = vmatmul.msk.f32.gmra.mxu1 %vm314_vm1, %v2607_v54 }
  0xf1   : > { %v2797_v52 = vadd.f32 %v1032_v39, %v929_v48  ;;  %2103 = vmatmul.msk.f32.gmra.mxu2 %vm314_vm1, %v2573_v46  ;;  %v1035_v43 = vpop.f32.mrf.mxu0 }
  0xf4   : > { %v737_v44 = vpop.f32.mrf.mxu2  ;;  %2137 = vmatmul.msk.f32.gmra.mxu0 %vm314_vm1, %v2631_v58 }
  0xf5   : > { %2124 = vmatmul.msk.f32.gmra.mxu3 %vm314_vm1, %v2555_v40  ;;  %v781_v36 = vadd.f32 %v737_v44, %v605_v11  ;;  %v607_v27 = vpop.f32.mrf.mxu1 }
  0xf6   : > { %v608_v16 = vadd.f32 %v607_v27, %v2733_v22 }
  0xf7   : > { %v930_v47 = vadd.f32 %v886_v35, %v781_v36 }
  0xf8   : > { %v898_v6 = vpop.f32.mrf.mxu3  ;;  %2087 = vmatmul.msk.f32.gmra.mxu1 %vm314_vm1, %v2619_v56 }
  0xf9   : > { %v2807_v54 = vadd.f32 %v1035_v43, %v930_v47  ;;  %2104 = vmatmul.msk.f32.gmra.mxu2 %vm314_vm1, %v2580_v49  ;;  %v1038_v46 = vpop.f32.mrf.mxu0 }
  0xfc   : > { %v740_v21 = vpop.f32.mrf.mxu2  ;;  %2138 = vmatmul.msk.f32.gmra.mxu0 %vm314_vm1, %v2643_v60 }
  0xfd   : > { %2125 = vmatmul.msk.f32.gmra.mxu3 %vm314_vm1, %v2467_v9  ;;  %v782_v40 = vadd.f32 %v740_v21, %v608_v16  ;;  %v610_v35 = vpop.f32.mrf.mxu1 }
  0xfe   : > { %v611_v22 = vadd.f32 %v610_v35, %v2749_v28 }
  0xff   : > { %v931_v39 = vadd.f32 %v889_v45, %v782_v40 }
 0x100   : > { %v901_v3 = vpop.f32.mrf.mxu3  ;;  %2088 = vmatmul.msk.f32.gmra.mxu1 %vm314_vm1, %v2631_v58 }
 0x101   : > { %v2818_v56 = vadd.f32 %v1038_v46, %v931_v39  ;;  %2105 = vmatmul.msk.f32.gmra.mxu2 %vm314_vm1, %v2590_v51  ;;  %v1041_v49 = vpop.f32.mrf.mxu0 }
 0x104   : > { %v743_v7 = vpop.f32.mrf.mxu2  ;;  %2139 = vmatmul.msk.f32.gmra.mxu0 %vm314_vm1, %v2655_v62 }
 0x105   : > { %2126 = vmatmul.msk.f32.gmra.mxu3 %vm314_vm1, %v2498_v23  ;;  %v783_v9 = vadd.f32 %v743_v7, %v611_v22  ;;  %v613_v45 = vpop.f32.mrf.mxu1 }
 0x106   : > { %v614_v28 = vadd.f32 %v613_v45, %v2767_v38 }
 0x107   : > { %v932_v31 = vadd.f32 %v892_v30, %v783_v9 }
 0x108   : > { %v904_v20 = vpop.f32.mrf.mxu3  ;;  %2089 = vmatmul.msk.f32.gmra.mxu1 %vm314_vm1, %v2643_v60 }
 0x109   : > { %v2829_v58 = vadd.f32 %v1041_v49, %v932_v31  ;;  %2106 = vmatmul.msk.f32.gmra.mxu2 %vm314_vm1, %v2601_v53  ;;  %v1044_v51 = vpop.f32.mrf.mxu0 }
 0x10c   : > { %v746_v48 = vpop.f32.mrf.mxu2  ;;  %2140 = vmatmul.msk.f32.gmra.mxu0 %vm314_vm1, %v2667_v0 }
 0x10d   : > { %2127 = vmatmul.msk.f32.gmra.mxu3 %vm314_vm1, %v2527_v32  ;;  %v784_v23 = vadd.f32 %v746_v48, %v614_v28  ;;  %v616_v30 = vpop.f32.mrf.mxu1 }
 0x10e   : > { %v617_v38 = vadd.f32 %v616_v30, %v2690_v8 }
 0x10f   : > { %v933_v43 = vadd.f32 %v895_v2, %v784_v23 }
 0x110   : > { %v907_v11 = vpop.f32.mrf.mxu3  ;;  %2090 = vmatmul.msk.f32.gmra.mxu1 %vm314_vm1, %v2655_v62 }
 0x111   : > { %v2840_v60 = vadd.f32 %v1044_v51, %v933_v43  ;;  %2107 = vmatmul.msk.f32.gmra.mxu2 %vm314_vm1, %v2613_v55  ;;  %v1047_v53 = vpop.f32.mrf.mxu0 }
 0x114   : > { %v749_v44 = vpop.f32.mrf.mxu2  ;;  %2141 = vmatmul.msk.f32.gmra.mxu0 %vm314_vm1, %v2681_v4 }
 0x115   : > { %2128 = vmatmul.msk.f32.gmra.mxu3 %vm314_vm1, %v2541_v37  ;;  %v785_v32 = vadd.f32 %v749_v44, %v617_v38  ;;  %v619_v2 = vpop.f32.mrf.mxu1 }
 0x116   : > { %v620_v8 = vadd.f32 %v619_v2, %v2711_v14 }
 0x117   : > { %v934_v36 = vadd.f32 %v898_v6, %v785_v32 }
 0x118   : > { %v910_v27 = vpop.f32.mrf.mxu3  ;;  %2091 = vmatmul.msk.f32.gmra.mxu1 %vm314_vm1, %v2667_v0 }
 0x119   : > { %v2851_v62 = vadd.f32 %v1047_v53, %v934_v36  ;;  %2108 = vmatmul.msk.f32.gmra.mxu2 %vm314_vm1, %v2625_v57  ;;  %v1050_v55 = vpop.f32.mrf.mxu0  ;;  %v1797_v53 = vld [vmem:[%s3086_s3 + $0x18] sm:$0xff] }
 0x11a   : > { %1816 = vmatpush.msra.mxu3 %v1797_v53 }
 0x11c   : > { %v752_v47 = vpop.f32.mrf.mxu2  ;;  %2142 = vmatmul.msk.f32.gmra.mxu0 %vm314_vm1, %v2697_v10 }
 0x11d   : > { %2129 = vmatmul.msk.f32.gmra.mxu3 %vm314_vm1, %v2557_v41  ;;  %v786_v37 = vadd.f32 %v752_v47, %v620_v8  ;;  %v622_v6 = vpop.f32.mrf.mxu1 }
 0x11e   : > { %v623_v14 = vadd.f32 %v622_v6, %v2725_v18  ;;  %v1257_v6 = vld [vmem:[#allocation2 + $0xd8] sm:$0xff] }
 0x11f   : > { %v935_v46 = vadd.f32 %v901_v3, %v786_v37 }
 0x120   : > { %v913_v16 = vpop.f32.mrf.mxu3  ;;  %2092 = vmatmul.msk.f32.gmra.mxu1 %vm314_vm1, %v2681_v4 }
 0x121   : > { %v2862_v0 = vadd.f32 %v1050_v55, %v935_v46  ;;  %2109 = vmatmul.msk.f32.gmra.mxu2 %vm314_vm1, %v2637_v59  ;;  %v1053_v57 = vpop.f32.mrf.mxu0  ;;  %v1554_v55 = vld [vmem:[#allocation2 + $0xca] sm:$0xff] }
 0x124   : > { %v755_v21 = vpop.f32.mrf.mxu2  ;;  %2143 = vmatmul.msk.f32.gmra.mxu0 %vm314_vm1, %v2713_v15 }
 0x125   : > { %2130 = vmatmul.msk.f32.gmra.mxu3 %vm314_vm1, %v2751_v29  ;;  %v787_v41 = vadd.f32 %v755_v21, %v623_v14  ;;  %v625_v40 = vpop.f32.mrf.mxu1  ;;  %v3098_v14 = vld [vmem:[#allocation9_spill] sm:$0xff] }
 0x126   : > { %v626_v18 = vadd.f32 %v625_v40, %v2741_v25  ;;  %v1406_v25 = vld [vmem:[#allocation2 + $0xd9] sm:$0xff] }
 0x127   : > { %v936_v35 = vadd.f32 %v904_v20, %v787_v41 }
 0x128   : > { %v916_v39 = vpop.f32.mrf.mxu3  ;;  %2093 = vmatmul.msk.f32.gmra.mxu1 %vm314_vm1, %v2697_v10 }
 0x129   : > { %v2873_v4 = vadd.f32 %v1053_v57, %v936_v35  ;;  %2110 = vmatmul.msk.f32.gmra.mxu2 %vm314_vm1, %v2649_v61  ;;  %v1056_v59 = vpop.f32.mrf.mxu0  ;;  %v1258_v35 = vld [vmem:[#allocation2 + $0xe0] sm:$0xff] }
 0x12c   : > { %v758_v3 = vpop.f32.mrf.mxu2  ;;  %2144 = vmatmul.msk.f32.gmra.mxu0 %vm314_vm1, %v2727_v19 }
 0x12d   : > { %2131 = vmatmul.msk.f32.gmra.mxu3 %vm314_vm1, %v2769_v42  ;;  %v788_v29 = vadd.f32 %v758_v3, %v626_v18  ;;  %v628_v49 = vpop.f32.mrf.mxu1  ;;  %v1556_v3 = vld [vmem:[#allocation2 + $0xe2] sm:$0xff] }
 0x12e   : > { %v629_v9 = vadd.f32 %v628_v49, %v2759_v33  ;;  %v1407_v33 = vld [vmem:[#allocation2 + $0xe1] sm:$0xff] }
 0x12f   : > { %v937_v22 = vadd.f32 %v907_v11, %v788_v29  ;;  %v3099_v49 = vld [vmem:[#allocation10_spill] sm:$0xff] }
 0x130   : > { %v919_v7 = vpop.f32.mrf.mxu3  ;;  %2094 = vmatmul.msk.f32.gmra.mxu1 %vm314_vm1, %v2713_v15 }
 0x131   : > { %v2884_v10 = vadd.f32 %v1056_v59, %v937_v22  ;;  %2111 = vmatmul.msk.f32.gmra.mxu2 %vm314_vm1, %v2661_v63  ;;  %v1059_v61 = vpop.f32.mrf.mxu0 }
 0x134   : > { %v761_v45 = vpop.f32.mrf.mxu2  ;;  %2145 = vmatmul.msk.f32.gmra.mxu0 %vm314_vm1, %v2743_v26 }
 0x135   : > { %2132 = vmatmul.msk.f32.gmra.mxu3 %vm314_vm1, %v1406_v25  ;;  %v789_v42 = vadd.f32 %v761_v45, %v629_v9  ;;  %v631_v31 = vpop.f32.mrf.mxu1 }
 0x136   : > { %v632_v28 = vadd.f32 %v631_v31, %v2703_v12  ;;  %v1553_v12 = vld [vmem:[#allocation2 + $0xc2] sm:$0xff] }
 0x137   : > { %v938_v20 = vadd.f32 %v910_v27, %v789_v42 }
 0x138   : > { %v922_v51 = vpop.f32.mrf.mxu3  ;;  %2095 = vmatmul.msk.f32.gmra.mxu1 %vm314_vm1, %v2727_v19 }
 0x139   : > { %v2894_v15 = vadd.f32 %v1059_v61, %v938_v20  ;;  %2112 = vmatmul.msk.f32.gmra.mxu2 %vm314_vm1, %v2673_v1  ;;  %v1062_v63 = vpop.f32.mrf.mxu0 }
 0x13c   : > { %v764_v48 = vpop.f32.mrf.mxu2  ;;  %2146 = vmatmul.msk.f32.gmra.mxu0 %vm314_vm1, %v2761_v34 }
 0x13d   : > { %2133 = vmatmul.msk.f32.gmra.mxu3 %vm314_vm1, %v1407_v33  ;;  %v790_v23 = vadd.f32 %v764_v48, %v632_v28  ;;  %v634_v30 = vpop.f32.mrf.mxu1 }
 0x13e   : > { %v635_v38 = vadd.f32 %v634_v30, %v2719_v17 }
 0x13f   : > { %v939_v43 = vadd.f32 %v913_v16, %v790_v23  ;;  %v1796_v23 = vld [vmem:[%s3086_s3 + $0x10] sm:$0xff] }
 0x140   : > { %v925_v11 = vpop.f32.mrf.mxu3  ;;  %2096 = vmatmul.msk.f32.gmra.mxu1 %vm314_vm1, %v2743_v26  ;;  %1817 = vmatpush.msra.mxu3 %v1796_v23 }
 0x141   : > { %v2904_v19 = vadd.f32 %v1062_v63, %v939_v43  ;;  %2113 = vmatmul.msk.f32.gmra.mxu2 %vm314_vm1, %v2687_v5  ;;  %v1065_v1 = vpop.f32.mrf.mxu0 }
 0x144   : > { %v767_v44 = vpop.f32.mrf.mxu2  ;;  %2147 = vmatmul.msk.f32.gmra.mxu0 %vm314_vm1, %v1553_v12 }
 0x145   : > { %v791_v32 = vadd.f32 %v767_v44, %v635_v38  ;;  %v637_v2 = vpop.f32.mrf.mxu1 }
 0x146   : > { %v638_v8 = vadd.f32 %v637_v2, %v2735_v24 }
 0x147   : > { %v940_v26 = vadd.f32 %v916_v39, %v791_v32 }
 0x148   : > { %v1477_v36 = vpop.f32.mrf.mxu3  ;;  %2097 = vmatmul.msk.f32.gmra.mxu1 %vm314_vm1, %v2761_v34 }
 0x149   : > { %v2915_v5 = vadd.f32 %v1065_v1, %v940_v26  ;;  %2114 = vmatmul.msk.f32.gmra.mxu2 %vm314_vm1, %v2705_v13  ;;  %v1068_v27 = vpop.f32.mrf.mxu0  ;;  %v1555_v13 = vld [vmem:[#allocation2 + $0xda] sm:$0xff] }
 0x14c   : > { %v770_v17 = vpop.f32.mrf.mxu2  ;;  %2148 = vmatmul.msk.f32.gmra.mxu0 %vm314_vm1, %v1554_v55 }
 0x14d   : > { %v792_v47 = vadd.f32 %v770_v17, %v638_v8  ;;  %v640_v37 = vpop.f32.mrf.mxu1 }
 0x14e   : > { %v641_v21 = vadd.f32 %v640_v37, %v3098_v14 }
 0x14f   : > { %v941_v46 = vadd.f32 %v919_v7, %v792_v47 }
 0x150   : > { %2098 = vmatmul.msk.f32.gmra.mxu1 %vm314_vm1, %v1553_v12  ;;  %v1480_v16 = vpop.f32.mrf.mxu3 }
 0x151   : > { %v2922_v34 = vadd.f32 %v1068_v27, %v941_v46  ;;  %2115 = vmatmul.msk.f32.gmra.mxu2 %vm314_vm1, %v1257_v6  ;;  %v1071_v57 = vpop.f32.mrf.mxu0 }
 0x154   : > { %v773_v41 = vpop.f32.mrf.mxu2  ;;  %2149 = vmatmul.msk.f32.gmra.mxu0 %vm314_vm1, %v1555_v13 }
 0x155   : > { %v793_v24 = vadd.f32 %v773_v41, %v641_v21  ;;  %v643_v40 = vpop.f32.mrf.mxu1 }
 0x156   : > { %v644_v22 = vadd.f32 %v643_v40, %v3099_v49 }
 0x157   : > { %v942_v39 = vadd.f32 %v922_v51, %v793_v24 }
 0x158   : > { %2099 = vmatmul.msk.f32.gmra.mxu1 %vm314_vm1, %v1554_v55  ;;  %v1483_v29 = vpop.f32.mrf.mxu3 }
 0x159   : > { %v2928_v59 = vadd.f32 %v1071_v57, %v942_v39  ;;  %2116 = vmatmul.msk.f32.gmra.mxu2 %vm314_vm1, %v1258_v35  ;;  %v1074_v18 = vpop.f32.mrf.mxu0 }
 0x15c   : > { %v776_v7 = vpop.f32.mrf.mxu2  ;;  %2150 = vmatmul.msk.f32.gmra.mxu0 %vm314_vm1, %v1556_v3 }
 0x15d   : > { %v794_v61 = vadd.f32 %v776_v7, %v644_v22  ;;  %v1178_v25 = vpop.f32.mrf.mxu1 }
 0x15e   : > { %v1226_v9 = vadd.f32 %v1178_v25, %v2787_v50 }
 0x15f   : > { %v943_v45 = vadd.f32 %v925_v11, %v794_v61 }
 0x160   : > { %v1486_v51 = vpop.f32.mrf.mxu3 }
 0x161   : > { %v2934_v42 = vadd.f32 %v1074_v18, %v943_v45  ;;  %v1626_v31 = vpop.f32.mrf.mxu0 }
 0x164   : > { %v1328_v20 = vpop.f32.mrf.mxu2 }
 0x165   : > { %v1376_v63 = vadd.f32 %v1328_v20, %v1226_v9  ;;  %v1181_v33 = vpop.f32.mrf.mxu1  ;;  %v1795_v20 = vld [vmem:[%s3086_s3 + $0x8] sm:$0xff] }
 0x166   : > { %v1227_v28 = vadd.f32 %v1181_v33, %v2797_v52  ;;  %v2944_v52 = vld [vmem:[%s3085_s2] ss:$0 sm:$0xff]  ;;  %1818 = vmatpush.msra.mxu3 %v1795_v20 }
 0x167   : > { %v1525_v48 = vadd.f32 %v1477_v36, %v1376_v63 }
 0x168   : > { %v1489_v53 = vpop.f32.mrf.mxu3 }
 0x169   : > { %v1674_v30 = vadd.f32 %v1626_v31, %v1525_v48  ;;  %v1629_v43 = vpop.f32.mrf.mxu0 }
 0x16b   : > { %v1694_v55 = vadd.f32 %v2944_v52, %v1674_v30 }
 0x16c   : > { %v1331_v1 = vpop.f32.mrf.mxu2 }
 0x16d   : > { %v1377_v50 = vadd.f32 %v1331_v1, %v1227_v28  ;;  %v1184_v11 = vpop.f32.mrf.mxu1  ;;  %v1710_v37 = vmax.f32 %v1694_v55, 0.0 }
 0x16e   : > { %v1228_v12 = vadd.f32 %v1184_v11, %v2807_v54 }
 0x16f   : > { %v1526_v38 = vadd.f32 %v1480_v16, %v1377_v50  ;;  %v1727_v21 = vsel %vm1726_vm3, %v1710_v37, 0.0 }
 0x170   : > { %v1492_v17 = vpop.f32.mrf.mxu3 }
 0x171   : > { %v1675_v44 = vadd.f32 %v1629_v43, %v1526_v38  ;;  %v1632_v32 = vpop.f32.mrf.mxu0 }
 0x174   : > { %v1334_v2 = vpop.f32.mrf.mxu2 }
 0x175   : > { %v1378_v26 = vadd.f32 %v1334_v2, %v1228_v12  ;;  %v1187_v36 = vpop.f32.mrf.mxu1 }
 0x176   : > { %v1229_v27 = vadd.f32 %v1187_v36, %v2818_v56  ;;  %v1695_v56 = vadd.f32 %v2944_v52, %v1675_v44 }
 0x177   : > { %v1527_v8 = vadd.f32 %v1483_v29, %v1378_v26 }
 0x178   : > { %v1495_v18 = vpop.f32.mrf.mxu3  ;;  %v1711_v3 = vmax.f32 %v1695_v56, 0.0 }
 0x179   : > { %v1676_v47 = vadd.f32 %v1632_v32, %v1527_v8  ;;  %v1635_v54 = vpop.f32.mrf.mxu0 }
 0x17a   : > { %v1742_v25 = vsel %vm1726_vm3, %v1711_v3, 0.0 }
 0x17b   : > { %v1696_v6 = vadd.f32 %v2944_v52, %v1676_v47 }
 0x17c   : > { %v1337_v46 = vpop.f32.mrf.mxu2 }
 0x17d   : > { %v1712_v16 = vmax.f32 %v1696_v6, 0.0  ;;  %v1379_v57 = vadd.f32 %v1337_v46, %v1229_v27  ;;  %v1190_v13 = vpop.f32.mrf.mxu1 }
 0x17e   : > { %v1230_v14 = vadd.f32 %v1190_v13, %v2829_v58 }
 0x17f   : > { %v1728_v41 = vsel %vm1726_vm3, %v1712_v16, 0.0  ;;  %v1528_v24 = vadd.f32 %v1486_v51, %v1379_v57 }
 0x180   : > { %v1729_v40 = vadd.f32 %v1728_v41, %v1727_v21  ;;  %v1498_v48 = vpop.f32.mrf.mxu3 }
 0x181   : > { %v1677_v35 = vadd.f32 %v1635_v54, %v1528_v24  ;;  %v1638_v39 = vpop.f32.mrf.mxu0 }
 0x183   : > { %v1697_v29 = vadd.f32 %v2944_v52, %v1677_v35 }
 0x184   : > { %v1340_v49 = vpop.f32.mrf.mxu2 }
 0x185   : > { %v1713_v22 = vmax.f32 %v1697_v29, 0.0  ;;  %v1380_v7 = vadd.f32 %v1340_v49, %v1230_v14  ;;  %v1193_v61 = vpop.f32.mrf.mxu1 }
 0x186   : > { %v1231_v58 = vadd.f32 %v1193_v61, %v2840_v60 }
 0x187   : > { %v1743_v9 = vsel %vm1726_vm3, %v1713_v22, 0.0  ;;  %v1529_v45 = vadd.f32 %v1489_v53, %v1380_v7  ;;  %v1794_v22 = vld [vmem:[%s3086_s3] sm:$0xff] }
 0x188   : > { %v1744_v31 = vadd.f32 %v1743_v9, %v1742_v25  ;;  %v1501_v36 = vpop.f32.mrf.mxu3  ;;  %1819 = vmatpush.msra.mxu3 %v1794_v22 }
 0x189   : > { %v1678_v51 = vadd.f32 %v1638_v39, %v1529_v45  ;;  %v1641_v63 = vpop.f32.mrf.mxu0 }
 0x18b   : > { %v1698_v33 = vadd.f32 %v2944_v52, %v1678_v51 }
 0x18c   : > { %v1343_v28 = vpop.f32.mrf.mxu2 }
 0x18d   : > { %v1714_v23 = vmax.f32 %v1698_v33, 0.0  ;;  %v1381_v30 = vadd.f32 %v1343_v28, %v1231_v58  ;;  %v1196_v60 = vpop.f32.mrf.mxu1 }
 0x18e   : > { %v1232_v53 = vadd.f32 %v1196_v60, %v2851_v62 }
 0x18f   : > { %v1730_v43 = vsel %vm1726_vm3, %v1714_v23, 0.0  ;;  %v1530_v1 = vadd.f32 %v1492_v17, %v1381_v30 }
 0x190   : > { %v1731_v50 = vadd.f32 %v1730_v43, %v1729_v40  ;;  %v1504_v21 = vpop.f32.mrf.mxu3 }
 0x191   : > { %v1679_v11 = vadd.f32 %v1641_v63, %v1530_v1  ;;  %v1644_v12 = vpop.f32.mrf.mxu0 }
 0x193   : > { %v1699_v38 = vadd.f32 %v2944_v52, %v1679_v11 }
 0x194   : > { %v1346_v44 = vpop.f32.mrf.mxu2 }
 0x195   : > { %v1715_v32 = vmax.f32 %v1699_v38, 0.0  ;;  %v1382_v2 = vadd.f32 %v1346_v44, %v1232_v53  ;;  %v1199_v26 = vpop.f32.mrf.mxu1 }
 0x196   : > { %v1233_v17 = vadd.f32 %v1199_v26, %v2862_v0 }
 0x197   : > { %v1745_v27 = vsel %vm1726_vm3, %v1715_v32, 0.0  ;;  %v1531_v55 = vadd.f32 %v1495_v18, %v1382_v2 }
 0x198   : > { %v1746_v8 = vadd.f32 %v1745_v27, %v1744_v31  ;;  %v1507_v58 = vpop.f32.mrf.mxu3 }
 0x199   : > { %v1680_v47 = vadd.f32 %v1644_v12, %v1531_v55  ;;  %v1647_v54 = vpop.f32.mrf.mxu0 }
 0x19b   : > { %v1700_v37 = vadd.f32 %v2944_v52, %v1680_v47 }
 0x19c   : > { %v1349_v6 = vpop.f32.mrf.mxu2 }
 0x19d   : > { %v1716_v46 = vmax.f32 %v1700_v37, 0.0  ;;  %v1383_v62 = vadd.f32 %v1349_v6, %v1233_v17  ;;  %v1202_v16 = vpop.f32.mrf.mxu1 }
 0x19e   : > { %v1234_v24 = vadd.f32 %v1202_v16, %v2873_v4 }
 0x19f   : > { %v1732_v57 = vsel %vm1726_vm3, %v1716_v46, 0.0  ;;  %v1532_v13 = vadd.f32 %v1498_v48, %v1383_v62 }
 0x1a0   : > { %v1733_v14 = vadd.f32 %v1732_v57, %v1731_v50  ;;  %v1510_v43 = vpop.f32.mrf.mxu3 }
 0x1a1   : > { %v1681_v56 = vadd.f32 %v1647_v54, %v1532_v13  ;;  %v1650_v41 = vpop.f32.mrf.mxu0 }
 0x1a3   : > { %v1701_v40 = vadd.f32 %v2944_v52, %v1681_v56 }
 0x1a4   : > { %v1352_v35 = vpop.f32.mrf.mxu2 }
 0x1a5   : > { %v1717_v39 = vmax.f32 %v1701_v40, 0.0  ;;  %v1384_v0 = vadd.f32 %v1352_v35, %v1234_v24  ;;  %v1205_v18 = vpop.f32.mrf.mxu1 }
 0x1a6   : > { %v1235_v4 = vadd.f32 %v1205_v18, %v2884_v10 }
 0x1a7   : > { %v1747_v3 = vsel %vm1726_vm3, %v1717_v39, 0.0  ;;  %v1533_v29 = vadd.f32 %v1501_v36, %v1384_v0 }
 0x1a8   : > { %v1748_v49 = vadd.f32 %v1747_v3, %v1746_v8  ;;  %v1513_v55 = vpop.f32.mrf.mxu3 }
 0x1a9   : > { %v1682_v7 = vadd.f32 %v1650_v41, %v1533_v29  ;;  %v1653_v61 = vpop.f32.mrf.mxu0 }
 0x1ab   : > { %v1702_v25 = vadd.f32 %v2944_v52, %v1682_v7  ;;  %v1769_v7 = vld [vmem:[%s3089_s6 + $0x18] sm:$0xff] }
 0x1ac   : > { %v1355_v9 = vpop.f32.mrf.mxu2  ;;  %1785 = vmatpush.msrb.mxu1 %v1769_v7 }
 0x1ad   : > { %v1718_v45 = vmax.f32 %v1702_v25, 0.0  ;;  %v1385_v31 = vadd.f32 %v1355_v9, %v1235_v4  ;;  %v1208_v20 = vpop.f32.mrf.mxu1  ;;  %v1768_v4 = vld [vmem:[%s3089_s6 + $0x10] sm:$0xff] }
 0x1ae   : > { %v1236_v23 = vadd.f32 %v1208_v20, %v2894_v15  ;;  %1786 = vmatpush.msrb.mxu1 %v1768_v4  ;;  %v1767_v20 = vld [vmem:[%s3089_s6 + $0x8] sm:$0xff] }
 0x1af   : > { %v1734_v51 = vsel %vm1726_vm3, %v1718_v45, 0.0  ;;  %v1534_v63 = vadd.f32 %v1504_v21, %v1385_v31 }
 0x1b0   : > { %v1735_v33 = vadd.f32 %v1734_v51, %v1733_v14  ;;  %v1516_v56 = vpop.f32.mrf.mxu3  ;;  %1787 = vmatpush.msrb.mxu1 %v1767_v20 }
 0x1b1   : > { %v1683_v28 = vadd.f32 %v1653_v61, %v1534_v63  ;;  %v1656_v48 = vpop.f32.mrf.mxu0 }
 0x1b3   : > { %v1703_v30 = vadd.f32 %v2944_v52, %v1683_v28 }
 0x1b4   : > { %v1358_v60 = vpop.f32.mrf.mxu2 }
 0x1b5   : > { %v1719_v1 = vmax.f32 %v1703_v30, 0.0  ;;  %v1386_v10 = vadd.f32 %v1358_v60, %v1236_v23  ;;  %v1211_v50 = vpop.f32.mrf.mxu1  ;;  %v1832_v23 = vld [vmem:[%s3087_s4 + $0x18] sm:$0xff]  ;;  %v1831_v30 = vld [vmem:[%s3087_s4 + $0x10] sm:$0xff] }
 0x1b6   : > { %v1237_v32 = vadd.f32 %v1211_v50, %v2904_v19  ;;  %1855 = vmatpush.msrb.mxu3 %v1832_v23 }
 0x1b7   : > { %v1749_v11 = vsel %vm1726_vm3, %v1719_v1, 0.0  ;;  %v1535_v12 = vadd.f32 %v1507_v58, %v1386_v10  ;;  %v1830_v1 = vld [vmem:[%s3087_s4 + $0x8] sm:$0xff] }
 0x1b8   : > { %v1750_v53 = vadd.f32 %v1749_v11, %v1748_v49  ;;  %v1519_v61 = vpop.f32.mrf.mxu3  ;;  %1856 = vmatpush.msrb.mxu3 %v1831_v30 }
 0x1b9   : > { %v1684_v38 = vadd.f32 %v1656_v48, %v1535_v12  ;;  %v1659_v44 = vpop.f32.mrf.mxu0 }
 0x1ba   : > { %1857 = vmatpush.msrb.mxu3 %v1830_v1 }
 0x1bb   : > { %v1704_v2 = vadd.f32 %v2944_v52, %v1684_v38 }
 0x1bc   : > { %v1361_v26 = vpop.f32.mrf.mxu2 }
 0x1bd   : > { %v1720_v36 = vmax.f32 %v1704_v2, 0.0  ;;  %v1387_v15 = vadd.f32 %v1361_v26, %v1237_v32  ;;  %v1214_v27 = vpop.f32.mrf.mxu1 }
 0x1be   : > { %v1238_v6 = vadd.f32 %v1214_v27, %v2915_v5 }
 0x1bf   : > { %v1736_v8 = vsel %vm1726_vm3, %v1720_v36, 0.0  ;;  %v1536_v47 = vadd.f32 %v1510_v43, %v1387_v15 }
 0x1c0   : > { %v1737_v54 = vadd.f32 %v1736_v8, %v1735_v33  ;;  %v1522_v50 = vpop.f32.mrf.mxu3 }
 0x1c1   : > { %v1685_v17 = vadd.f32 %v1659_v44, %v1536_v47  ;;  %v1662_v37 = vpop.f32.mrf.mxu0 }
 0x1c3   : > { %v1705_v46 = vadd.f32 %v2944_v52, %v1685_v17 }
 0x1c4   : > { %v1364_v62 = vpop.f32.mrf.mxu2 }
 0x1c5   : > { %v1721_v16 = vmax.f32 %v1705_v46, 0.0  ;;  %v1388_v19 = vadd.f32 %v1364_v62, %v1238_v6  ;;  %v1217_v57 = vpop.f32.mrf.mxu1 }
 0x1c6   : > { %v1239_v40 = vadd.f32 %v1217_v57, %v2922_v34 }
 0x1c7   : > { %v1751_v13 = vsel %vm1726_vm3, %v1721_v16, 0.0  ;;  %v1537_v14 = vadd.f32 %v1513_v55, %v1388_v19 }
 0x1c8   : > { %v1752_v21 = vadd.f32 %v1751_v13, %v1750_v53  ;;  %v1829_v53 = vld [vmem:[%s3087_s4] sm:$0xff] }
 0x1c9   : > { %v1686_v41 = vadd.f32 %v1662_v37, %v1537_v14  ;;  %v1665_v24 = vpop.f32.mrf.mxu0  ;;  %1858 = vmatpush.msrb.mxu3 %v1829_v53 }
 0x1cb   : > { %v1706_v35 = vadd.f32 %v2944_v52, %v1686_v41 }
 0x1cc   : > { %v1367_v39 = vpop.f32.mrf.mxu2 }
 0x1cd   : > { %v1722_v0 = vmax.f32 %v1706_v35, 0.0  ;;  %v1389_v5 = vadd.f32 %v1367_v39, %v1239_v40  ;;  %v1220_v18 = vpop.f32.mrf.mxu1 }
 0x1ce   : > { %v1240_v58 = vadd.f32 %v1220_v18, %v2928_v59  ;;  %v1766_v59 = vld [vmem:[%s3089_s6] sm:$0xff] }
 0x1cf   : > { %v1738_v3 = vsel %vm1726_vm3, %v1722_v0, 0.0  ;;  %v1538_v29 = vadd.f32 %v1516_v56, %v1389_v5  ;;  %1788 = vmatpush.msrb.mxu1 %v1766_v59 }
 0x1d0   : > { %v1739_v49 = vadd.f32 %v1738_v3, %v1737_v54 }
 0x1d1   : > { %v1687_v22 = vadd.f32 %v1665_v24, %v1538_v29  ;;  %v1668_v9 = vpop.f32.mrf.mxu0 }
 0x1d3   : > { %v1707_v34 = vadd.f32 %v2944_v52, %v1687_v22 }
 0x1d4   : > { %v1370_v25 = vpop.f32.mrf.mxu2 }
 0x1d5   : > { %v1723_v45 = vmax.f32 %v1707_v34, 0.0  ;;  %v1390_v31 = vadd.f32 %v1370_v25, %v1240_v58  ;;  %v1223_v28 = vpop.f32.mrf.mxu1 }
 0x1d6   : > { %v1241_v60 = vadd.f32 %v1223_v28, %v2934_v42 }
 0x1d7   : > { %v1753_v51 = vsel %vm1726_vm3, %v1723_v45, 0.0  ;;  %v1539_v63 = vadd.f32 %v1519_v61, %v1390_v31 }
 0x1d8   : > { %v1754_v33 = vadd.f32 %v1753_v51, %v1752_v21 }
 0x1d9   : > { %v1688_v48 = vadd.f32 %v1668_v9, %v1539_v63  ;;  %v1671_v38 = vpop.f32.mrf.mxu0 }
 0x1db   : > { %v1708_v43 = vadd.f32 %v2944_v52, %v1688_v48 }
 0x1dc   : > { %v1373_v10 = vpop.f32.mrf.mxu2 }
 0x1dd   : > { %v1724_v11 = vmax.f32 %v1708_v43, 0.0  ;;  %v1391_v12 = vadd.f32 %v1373_v10, %v1241_v60 }
 0x1df   : > { %v1740_v44 = vsel %vm1726_vm3, %v1724_v11, 0.0  ;;  %v1540_v42 = vadd.f32 %v1522_v50, %v1391_v12 }
 0x1e0   : > { %v1741_v32 = vadd.f32 %v1740_v44, %v1739_v49 }
 0x1e1   : > { %v1689_v2 = vadd.f32 %v1671_v38, %v1540_v42 }
 0x1e2   : > { %2152 = vmatmul.msk.f32.vlgmr.msra.gmra.mxu3 %vm1726_vm3, %v1741_v32  ;;  %v1757_v55 = vsel %vm1726_vm3, %v1741_v32, 0.0 }
 0x1e3   : > { %v1709_v26 = vadd.f32 %v2944_v52, %v1689_v2 }
 0x1e5   : > { %v1725_v36 = vmax.f32 %v1709_v26, 0.0 }
 0x1e7   : > { %v1755_v15 = vsel %vm1726_vm3, %v1725_v36, 0.0 }
 0x1e8   : > { %v1756_v27 = vadd.f32 %v1755_v15, %v1754_v33 }
 0x1ea   : > { %v1758_v8 = vsel %vm1726_vm3, %v1756_v27, 0.0  ;;  %2153 = vmatmul.msk.f32.gmra.mxu3 %vm1726_vm3, %v1756_v27 }
 0x1eb   : > { %v1759_v47 = vadd.f32 %v1758_v8, %v1757_v55 }
 0x1ed   : > { %v1760_v54 = vrot.slane %v1759_v47, 4 }
 0x1ef   : > { %v1761_v17 = vadd.f32 %v1760_v54, %v1759_v47 }
 0x1f1   : > { %v1762_v37 = vrot.slane %v1761_v17, 2 }
 0x1f3   : > { %v1763_v6 = vadd.f32 %v1762_v37, %v1761_v17 }
 0x1f5   : > { %v1764_v46 = vrot.slane %v1763_v6, 1 }
 0x1f7   : > { %v1765_v62 = vadd.f32 %v1764_v46, %v1763_v6 }
 0x1f9   : > { %2151 = vmatmul.msk.f32.vlgmr.msrb.gmra.mxu1 %vm1726_vm3, %v1765_v62 }
 0x265   : > { %v1821_v52 = vpop.f32.mrf.mxu3 }
 0x266   : > { %v1827_v16 = vmax.f32 %v1821_v52, 0.0 }
 0x268   : > { %2154 = vmatmul.msk.f32.vlgmr.msrb.gmra.mxu3 %vm1726_vm3, %v1827_v16 }
 0x26d   : > { %v1824_v19 = vpop.f32.mrf.mxu3 }
 0x26e   : > { %v1828_v57 = vmax.f32 %v1824_v19, 0.0 }
 0x270   : > { %2155 = vmatmul.msk.f32.gmra.mxu3 %vm1726_vm3, %v1828_v57 }
 0x276   : > { %v1790_v13 = vpop.f32.mrf.mxu1 }
 0x277   : > { %1793 = vst [vmem:[%s308_s12] sm:$0x1] %v1790_v13 }
 0x278   : > { %2241 = shalt.err (!%p2238_p3)
}
 0x279   : > { %2166 = dma.vmem_to_hbm [thread:$0]  (%p2396_p5), %s1902_s13, 16, %s1904_s20, %s1874_s21   ;;  %v2213_v14 = vld [vmem:[%s3088_s5] ss:$0 sm:$0xff] }
 0x27a   : > { %s1995_s12 = sshll.u32 %s3028_s10, 4  ;;  %s2162_s24 = sshll.u32 %s2379_s9, 4 }
 0x27b   : > { %s1884_s23 = scalar_lea.hbm %s3090_s7, %s2162_s24  ;;  %s302_s25 = scalar_lea.vmem [#allocation3], %s1995_s12 }
 0x27c   : > { %s1885_s26 = sshll.u32 %s302_s25, 4  ;;  %s1887_s17 = sshll.u32 %s1884_s23, 4  ;;  %s1886_s26 = int_to_ptr.vmem [resolvable:$true] %s1885_s26  ;;  %s1888_s17 = int_to_ptr.hbm [resolvable:$true] %s1887_s17 }
 0x27d   : > { %s1869_s13 = scalar_lea.sflag [#allocation4], %s3028_s10  ;;  %s2256_s20 = sshra.s32 %s1888_s17, 4  ;;  %s2257_s20 = int_to_ptr.hbm [resolvable:$true] %s2256_s20 }
 0x27e   : > { %s2258_s9 = scalar_lea.hbm %s2257_s20, 16  ;;  %s2262_s12 = scalar_lea.hbm %s3090_s7, 32 }
 0x27f   : > { %p2259_p4 = scmp.ne.s32.totalorder %s2257_s20, %s2258_s9  ;;  %p2263_p9 = scmp.lt.s32.totalorder %s2257_s20, %s3090_s7 }
 0x280   : > { %p2264_p10 = scmp.lt.s32.totalorder %s2262_s12, %s2258_s9 }
 0x281   : > { %p2260_p7 = pnand %p2259_p4, %p2396_p5 }
 0x282   : > { %p2265_p11 = por %p2264_p10, %p2263_p9 }
 0x283   : > { %p2261_p8 = pneg %p2260_p7 }
 0x285   : > { %p2266_p12 = pnand %p2265_p11, %p2261_p8 }
 0x2eb   : > { %v1860_v21 = vpop.f32.mrf.mxu3 }
 0x2ec   : > { %v1861_v56 = vadd.f32 %v2213_v14, %v1860_v21 }
 0x2ee   : > { %1866 = vst [vmem:[%s302_s25] sm:$0xff] %v1861_v56 }
 0x2f3   : > { %v1863_v41 = vpop.f32.mrf.mxu3 }
 0x2f4   : > { %v1864_v24 = vadd.f32 %v2213_v14, %v1863_v41 }
 0x2f6   : > { %1867 = vst [vmem:[%s302_s25 + $0x8] sm:$0xff] %v1864_v24 }
 0x2f7   : > { %2269 = shalt.err (!%p2266_p12)
}
 0x2f8   : > { %s2311_s10 = smov 128   ;;  %s2312_s0 = smov 8  }
 0x2f9   : > { %2165 = dma.vmem_to_hbm [thread:$0]  (%p2396_p5), %s1886_s26, 256, %s1888_s17, %s1869_s13, %s2311_s10, %s2311_s10, %s2312_s0  }
 0x2fa PF: > { %p2176_p13 = scmp.ge.s32.totalorder %s2308_s30, 2  ;;  %s1915_s22 = sand.u32 1, %s2296_s27  }
 0x2fb   : > { %s1916_s23 = scalar_lea.sflag [#allocation4], %s1915_s22 }
 0x2fc   : > { %p2170_p0 = pnand %p2176_p13, %p2400_p6 }
 0x2fe   : > { %p2171_p1 = pneg %p2170_p0 }
 0x300   : > { %2287 = dma.done.wait (%p2171_p1), %s1916_s23, 256  }
 0x301   : > { %2289 = vsyncadd (%p2171_p1), %s1916_s23, 4294967040  ;;  %s1926_s25 = scalar_lea.sflag [#allocation6], %s1915_s22 }
 0x302   : > { %2291 = dma.done.wait (%p2171_p1), %s1926_s25, 16  }
 0x303   : > { %2293 = vsyncadd (%p2171_p1), %s1926_s25, 4294967280  ;;  %p22_p5 = scmp.ge.s32.totalorder %s2383_s11, 4   ;;  %s3100_s27 = smov %s2300_s28 }
 0x304   : > { %s3101_s28 = smov %s2304_s29  ;;  %s3102_s29 = smov %s2394_s14 }
 0x305   : > { %s3103_s30 = smov %s2383_s11  ;;  %24 = sbr.rel (!%p22_p5) target bundleno = 7 (0x7), region = 102 }
 0x30a   :  { %1931 = vsyncpa [#allocation4], 1 }
 0x30b   :  { %1933 = vsyncpa [#allocation4 + $0x1], 1 }
 0x30c   :  { %1934 = vsyncpa [#allocation6], 1 }
 0x30d   :  { %1936 = vsyncpa [#allocation6 + $0x1], 1 }

</bundles_post_ra>
